<compile_context>
chip_gen: v7x
topology: tpu7x:2x2x1
jax: 0.10.0
libtpu: 0.0.40
codegen_flags: <defaults>
</compile_context>

<pallas_src>
import jax
import jax.numpy as jnp
from jax.experimental import pallas as pl
from jax.experimental.pallas import tpu as pltpu


def glove_kernel(ids_ref, table_ref, w1_ref, b1_ref, w2_ref, b2_ref, out_ref):
    ids = ids_ref[...]                       # [TB, L] int32
    tb, seq_len = ids.shape
    vocab = table_ref.shape[0]

    # ---- fused embedding-gather + mean: bag-of-words @ table ----
    # bag[b, v] = (1/L) * #{l : ids[b, l] == v}
    iota_v = jax.lax.broadcasted_iota(jnp.int32, (tb, vocab), 1)       # [TB, V]
    bag = jnp.zeros((tb, vocab), jnp.float32)
    for l in range(seq_len):                                           # static unroll (L small)
        bag = bag + (ids[:, l:l + 1] == iota_v).astype(jnp.float32)
    bag = bag * (1.0 / seq_len)

    pooled = jnp.dot(bag, table_ref[...],
                     preferred_element_type=jnp.float32)               # [TB, E]

    # ---- fc1 + ReLU ----
    h = jnp.dot(pooled, w1_ref[...], preferred_element_type=jnp.float32)
    h = jnp.maximum(h + b1_ref[...], 0.0)                              # [TB, H]

    # ---- fc2 (class dim padded to 128 for a lane-dense store) ----
    out = jnp.dot(h, w2_ref[...], preferred_element_type=jnp.float32)
    out_ref[...] = (out + b2_ref[...]).astype(out_ref.dtype)           # [TB, Cp]


def glove_forward(ids, table, w1, b1, w2, b2, *, tb=128):
    B, L = ids.shape
    V, E = table.shape
    H, C = w2.shape

    # Pad the class dim to a lane-dense multiple of 128 (unmasked stores).
    Cp = ((C + 127) // 128) * 128
    w2p = jnp.zeros((H, Cp), w2.dtype).at[:, :C].set(w2)
    b2p = jnp.zeros((1, Cp), b2.dtype).at[:, :C].set(b2.reshape(1, C))
    b1r = b1.reshape(1, H)

    # Pad the batch dim to a multiple of the batch tile (padded rows use
    # token id 0; their outputs are sliced away below).
    Bp = ((B + tb - 1) // tb) * tb
    ids_p = jnp.zeros((Bp, L), ids.dtype).at[:B, :].set(ids)

    out = pl.pallas_call(
        glove_kernel,
        out_shape=jax.ShapeDtypeStruct((Bp, Cp), jnp.float32),
        grid=(Bp // tb,),
        in_specs=[
            pl.BlockSpec((tb, L), lambda i: (i, 0)),   # ids: tiled over batch
            pl.BlockSpec((V, E), lambda i: (0, 0)),    # table: resident
            pl.BlockSpec((E, H), lambda i: (0, 0)),    # w1
            pl.BlockSpec((1, H), lambda i: (0, 0)),    # b1
            pl.BlockSpec((H, Cp), lambda i: (0, 0)),   # w2 (padded)
            pl.BlockSpec((1, Cp), lambda i: (0, 0)),   # b2 (padded)
        ],
        out_specs=pl.BlockSpec((tb, Cp), lambda i: (i, 0)),
        compiler_params=pltpu.CompilerParams(
            dimension_semantics=("parallel",)),
    )(ids_p, table, w1, b1r, w2p, b2p)

    return out[:B, :C]


def glove_reference(ids, table, w1, b1, w2, b2):
    emb = table[ids]                 # [B, L, E]
    pooled = emb.mean(axis=1)        # [B, E]
    h = jnp.maximum(pooled @ w1 + b1, 0.0)
    return h @ w2 + b2


if __name__ == "__main__":
    key = jax.random.PRNGKey(0)
    k_tab, k_ids, k_w1, k_b1, k_w2, k_b2 = jax.random.split(key, 6)

    VOCAB, EMB_DIM = 50, 32          # pretrained GloVe-like table (synthetic)
    HIDDEN, NUM_CLASSES = 128, 10
    B, L = 256, 8                    # batch tiled 2 x 128 over the grid

    # deterministic synthetic parameters
    table = jax.random.normal(k_tab, (VOCAB, EMB_DIM), dtype=jnp.float32)
    w1 = jax.random.normal(k_w1, (EMB_DIM, HIDDEN), dtype=jnp.float32) * 0.1
    b1 = jax.random.normal(k_b1, (1, HIDDEN), dtype=jnp.float32) * 0.1
    w2 = jax.random.normal(k_w2, (HIDDEN, NUM_CLASSES), dtype=jnp.float32) * 0.1
    b2 = jax.random.normal(k_b2, (1, NUM_CLASSES), dtype=jnp.float32) * 0.1

    ids = jax.random.randint(k_ids, (B, L), 0, VOCAB, dtype=jnp.int32)

    out = glove_forward(ids, table, w1, b1, w2, b2)
    out = jax.block_until_ready(out)

    ref = glove_reference(ids, table, w1, b1, w2, b2)
    assert out.shape == (B, NUM_CLASSES)
    assert jnp.allclose(out, ref, atol=1e-4, rtol=1e-4)

    print("KERNEL_OK")
</pallas_src>

<mosaic_0001>
module attributes {stable_mosaic.version = 11 : i64} {
  func.func @glove_kernel(%arg0: i32, %arg1: memref<128x8xi32, #tpu.memory_space<vmem>>, %arg2: memref<50x32xf32, #tpu.memory_space<vmem>>, %arg3: memref<32x128xf32, #tpu.memory_space<vmem>>, %arg4: memref<1x128xf32, #tpu.memory_space<vmem>>, %arg5: memref<128x128xf32, #tpu.memory_space<vmem>>, %arg6: memref<1x128xf32, #tpu.memory_space<vmem>>, %arg7: memref<128x128xf32, #tpu.memory_space<vmem>>) attributes {dimension_semantics = [#tpu.dimension_semantics<parallel>], iteration_bounds = array<i64: 2>, scalar_prefetch = 0 : i64, scratch_operands = 0 : i64, tpu.core_type = #tpu.core_type<tc>, window_params = [{transform_indices = @transform_0, window_bounds = array<i64: 128, 8>}, {pipeline_mode = #tpu.pipeline_mode<synchronous>, transform_indices = @transform_1, window_bounds = array<i64: 50, 32>}, {pipeline_mode = #tpu.pipeline_mode<synchronous>, transform_indices = @transform_2, window_bounds = array<i64: 32, 128>}, {pipeline_mode = #tpu.pipeline_mode<synchronous>, transform_indices = @transform_3, window_bounds = array<i64: 1, 128>}, {pipeline_mode = #tpu.pipeline_mode<synchronous>, transform_indices = @transform_4, window_bounds = array<i64: 128, 128>}, {pipeline_mode = #tpu.pipeline_mode<synchronous>, transform_indices = @transform_5, window_bounds = array<i64: 1, 128>}, {transform_indices = @transform_6, window_bounds = array<i64: 128, 128>}]} {
    %c0 = arith.constant 0 : index
    %c0_0 = arith.constant 0 : index
    %0 = vector.load %arg1[%c0, %c0_0] : memref<128x8xi32, #tpu.memory_space<vmem>>, vector<128x8xi32>
    %1 = tpu.iota {dimensions = array<i32: 1>} : vector<128x50xi32>
    %cst = arith.constant 0.000000e+00 : f32
    %2 = vector.broadcast %cst : f32 to vector<128x50xf32>
    %3 = vector.extract_strided_slice %0 {offsets = [0, 0], sizes = [128, 1], strides = [1, 1]} : vector<128x8xi32> to vector<128x1xi32>
    %4 = vector.broadcast %3 : vector<128x1xi32> to vector<128x50xi32>
    %5 = arith.cmpi eq, %4, %1 : vector<128x50xi32>
    %6 = arith.extui %5 : vector<128x50xi1> to vector<128x50xi32>
    %7 = arith.sitofp %6 : vector<128x50xi32> to vector<128x50xf32>
    %8 = arith.addf %2, %7 : vector<128x50xf32>
    %9 = vector.extract_strided_slice %0 {offsets = [0, 1], sizes = [128, 1], strides = [1, 1]} : vector<128x8xi32> to vector<128x1xi32>
    %10 = vector.broadcast %9 : vector<128x1xi32> to vector<128x50xi32>
    %11 = arith.cmpi eq, %10, %1 : vector<128x50xi32>
    %12 = arith.extui %11 : vector<128x50xi1> to vector<128x50xi32>
    %13 = arith.sitofp %12 : vector<128x50xi32> to vector<128x50xf32>
    %14 = arith.addf %8, %13 : vector<128x50xf32>
    %15 = vector.extract_strided_slice %0 {offsets = [0, 2], sizes = [128, 1], strides = [1, 1]} : vector<128x8xi32> to vector<128x1xi32>
    %16 = vector.broadcast %15 : vector<128x1xi32> to vector<128x50xi32>
    %17 = arith.cmpi eq, %16, %1 : vector<128x50xi32>
    %18 = arith.extui %17 : vector<128x50xi1> to vector<128x50xi32>
    %19 = arith.sitofp %18 : vector<128x50xi32> to vector<128x50xf32>
    %20 = arith.addf %14, %19 : vector<128x50xf32>
    %21 = vector.extract_strided_slice %0 {offsets = [0, 3], sizes = [128, 1], strides = [1, 1]} : vector<128x8xi32> to vector<128x1xi32>
    %22 = vector.broadcast %21 : vector<128x1xi32> to vector<128x50xi32>
    %23 = arith.cmpi eq, %22, %1 : vector<128x50xi32>
    %24 = arith.extui %23 : vector<128x50xi1> to vector<128x50xi32>
    %25 = arith.sitofp %24 : vector<128x50xi32> to vector<128x50xf32>
    %26 = arith.addf %20, %25 : vector<128x50xf32>
    %27 = vector.extract_strided_slice %0 {offsets = [0, 4], sizes = [128, 1], strides = [1, 1]} : vector<128x8xi32> to vector<128x1xi32>
    %28 = vector.broadcast %27 : vector<128x1xi32> to vector<128x50xi32>
    %29 = arith.cmpi eq, %28, %1 : vector<128x50xi32>
    %30 = arith.extui %29 : vector<128x50xi1> to vector<128x50xi32>
    %31 = arith.sitofp %30 : vector<128x50xi32> to vector<128x50xf32>
    %32 = arith.addf %26, %31 : vector<128x50xf32>
    %33 = vector.extract_strided_slice %0 {offsets = [0, 5], sizes = [128, 1], strides = [1, 1]} : vector<128x8xi32> to vector<128x1xi32>
    %34 = vector.broadcast %33 : vector<128x1xi32> to vector<128x50xi32>
    %35 = arith.cmpi eq, %34, %1 : vector<128x50xi32>
    %36 = arith.extui %35 : vector<128x50xi1> to vector<128x50xi32>
    %37 = arith.sitofp %36 : vector<128x50xi32> to vector<128x50xf32>
    %38 = arith.addf %32, %37 : vector<128x50xf32>
    %39 = vector.extract_strided_slice %0 {offsets = [0, 6], sizes = [128, 1], strides = [1, 1]} : vector<128x8xi32> to vector<128x1xi32>
    %40 = vector.broadcast %39 : vector<128x1xi32> to vector<128x50xi32>
    %41 = arith.cmpi eq, %40, %1 : vector<128x50xi32>
    %42 = arith.extui %41 : vector<128x50xi1> to vector<128x50xi32>
    %43 = arith.sitofp %42 : vector<128x50xi32> to vector<128x50xf32>
    %44 = arith.addf %38, %43 : vector<128x50xf32>
    %45 = vector.extract_strided_slice %0 {offsets = [0, 7], sizes = [128, 1], strides = [1, 1]} : vector<128x8xi32> to vector<128x1xi32>
    %46 = vector.broadcast %45 : vector<128x1xi32> to vector<128x50xi32>
    %47 = arith.cmpi eq, %46, %1 : vector<128x50xi32>
    %48 = arith.extui %47 : vector<128x50xi1> to vector<128x50xi32>
    %49 = arith.sitofp %48 : vector<128x50xi32> to vector<128x50xf32>
    %50 = arith.addf %44, %49 : vector<128x50xf32>
    %cst_1 = arith.constant 1.250000e-01 : f32
    %51 = vector.broadcast %cst_1 : f32 to vector<128x50xf32>
    %52 = arith.mulf %50, %51 : vector<128x50xf32>
    %c0_2 = arith.constant 0 : index
    %c0_3 = arith.constant 0 : index
    %53 = vector.load %arg2[%c0_2, %c0_3] : memref<50x32xf32, #tpu.memory_space<vmem>>, vector<50x32xf32>
    %cst_4 = arith.constant dense<0.000000e+00> : vector<128x32xf32>
    %54 = tpu.matmul %52, %53, %cst_4 {dimension_numbers = #tpu.dot_dimension_numbers<[1], [0], [0], [1], [0, 0, 1, 1], [], []>} : vector<128x50xf32>, vector<50x32xf32>, vector<128x32xf32> -> vector<128x32xf32>
    %c0_5 = arith.constant 0 : index
    %c0_6 = arith.constant 0 : index
    %55 = vector.load %arg3[%c0_5, %c0_6] : memref<32x128xf32, #tpu.memory_space<vmem>>, vector<32x128xf32>
    %cst_7 = arith.constant dense<0.000000e+00> : vector<128x128xf32>
    %56 = tpu.matmul %54, %55, %cst_7 {dimension_numbers = #tpu.dot_dimension_numbers<[1], [0], [0], [1], [0, 0, 1, 1], [], []>} : vector<128x32xf32>, vector<32x128xf32>, vector<128x128xf32> -> vector<128x128xf32>
    %c0_8 = arith.constant 0 : index
    %c0_9 = arith.constant 0 : index
    %57 = vector.load %arg4[%c0_8, %c0_9] : memref<1x128xf32, #tpu.memory_space<vmem>>, vector<1x128xf32>
    %58 = vector.broadcast %57 : vector<1x128xf32> to vector<128x128xf32>
    %59 = arith.addf %56, %58 : vector<128x128xf32>
    %cst_10 = arith.constant 0.000000e+00 : f32
    %60 = vector.broadcast %cst_10 : f32 to vector<128x128xf32>
    %61 = arith.maximumf %59, %60 : vector<128x128xf32>
    %c0_11 = arith.constant 0 : index
    %c0_12 = arith.constant 0 : index
    %62 = vector.load %arg5[%c0_11, %c0_12] : memref<128x128xf32, #tpu.memory_space<vmem>>, vector<128x128xf32>
    %cst_13 = arith.constant dense<0.000000e+00> : vector<128x128xf32>
    %63 = tpu.matmul %61, %62, %cst_13 {dimension_numbers = #tpu.dot_dimension_numbers<[1], [0], [0], [1], [0, 0, 1, 1], [], []>} : vector<128x128xf32>, vector<128x128xf32>, vector<128x128xf32> -> vector<128x128xf32>
    %c0_14 = arith.constant 0 : index
    %c0_15 = arith.constant 0 : index
    %64 = vector.load %arg6[%c0_14, %c0_15] : memref<1x128xf32, #tpu.memory_space<vmem>>, vector<1x128xf32>
    %65 = vector.broadcast %64 : vector<1x128xf32> to vector<128x128xf32>
    %66 = arith.addf %63, %65 : vector<128x128xf32>
    %c0_16 = arith.constant 0 : index
    %c0_17 = arith.constant 0 : index
    %67 = vector.load %arg7[%c0_16, %c0_17] : memref<128x128xf32, #tpu.memory_space<vmem>>, vector<128x128xf32>
    tpu.vector_store %arg7[%c0_16, %c0_17], %66 {strides = array<i32>} : memref<128x128xf32, #tpu.memory_space<vmem>>, vector<128x128xf32>,
    return
  }
  func.func @transform_0(%arg0: i32) -> (i32, i32) {
    %c0_i32 = arith.constant 0 : i32
    %c0_i32_0 = arith.constant 0 : i32
    return %arg0, %c0_i32 : i32, i32
  }
  func.func @transform_1(%arg0: i32) -> (i32, i32) {
    %c0_i32 = arith.constant 0 : i32
    %c0_i32_0 = arith.constant 0 : i32
    %c0_i32_1 = arith.constant 0 : i32
    return %c0_i32, %c0_i32_0 : i32, i32
  }
  func.func @transform_2(%arg0: i32) -> (i32, i32) {
    %c0_i32 = arith.constant 0 : i32
    %c0_i32_0 = arith.constant 0 : i32
    %c0_i32_1 = arith.constant 0 : i32
    return %c0_i32, %c0_i32_0 : i32, i32
  }
  func.func @transform_3(%arg0: i32) -> (i32, i32) {
    %c0_i32 = arith.constant 0 : i32
    %c0_i32_0 = arith.constant 0 : i32
    %c0_i32_1 = arith.constant 0 : i32
    return %c0_i32, %c0_i32_0 : i32, i32
  }
  func.func @transform_4(%arg0: i32) -> (i32, i32) {
    %c0_i32 = arith.constant 0 : i32
    %c0_i32_0 = arith.constant 0 : i32
    %c0_i32_1 = arith.constant 0 : i32
    return %c0_i32, %c0_i32_0 : i32, i32
  }
  func.func @transform_5(%arg0: i32) -> (i32, i32) {
    %c0_i32 = arith.constant 0 : i32
    %c0_i32_0 = arith.constant 0 : i32
    %c0_i32_1 = arith.constant 0 : i32
    return %c0_i32, %c0_i32_0 : i32, i32
  }
  func.func @transform_6(%arg0: i32) -> (i32, i32) {
    %c0_i32 = arith.constant 0 : i32
    %c0_i32_0 = arith.constant 0 : i32
    return %arg0, %c0_i32 : i32, i32
  }
}

</mosaic_0001>

<bundles_post_ra>
// kernel: tpu_custom_call.1
= control target key start
LH: loop header
LB: loop body
LE: loop exit
PB: predicated region body
PF: predicated region fallthrough
CT: control target
= control target key end

     0   :  { %11 = vsyncpa [#allocation3], 0  ;;  %s3596_s0 = inlined_call_operand.vmem [shape: s32[256,8], index: 0, kind: input, shape index: {}]   ;;  %s3597_s1 = inlined_call_operand.vmem [shape: f32[50,32], index: 1, kind: input, shape index: {}]   ;;  %s3598_s2 = inlined_call_operand.vmem [shape: f32[32,128], index: 2, kind: input, shape index: {}]   ;;  %s3599_s3 = inlined_call_operand.vmem [shape: f32[1,128], index: 3, kind: input, shape index: {}]   ;;  %s3600_s4 = inlined_call_operand.vmem [shape: f32[128,128], index: 4, kind: input, shape index: {}]   ;;  %s3601_s5 = inlined_call_operand.vmem [shape: f32[1,128], index: 5, kind: input, shape index: {}]   ;;  %s3602_s6 = inlined_call_operand.hbm [shape: f32[256,128], index: 6, kind: output, shape index: {}]  }
   0x1   :  { %13 = vsyncpa [#allocation3 + $0x1], 0  ;;  %s2566_s21 = smov 0   ;;  %s2568_s22 = smov 0  }
   0x2   :  { %s2570_s23 = smov 0   ;;  %s2572_s24 = smov 0  }
   0x3 LB: > { %s2587_s25 = sadd.s32 4294967295, %s2517_s24   ;;  %s1869_s26 = sadd.s32 4294967294, %s2517_s24   ;;  %s2517_s24 = sphi %s2572_s24, %s3637_s24   ;;  %s2513_s23 = sphi %s2570_s23, %s3636_s23   ;;  %s2509_s22 = sphi %s2568_s22, %s3635_s22   ;;  %s2505_s21 = sphi %s2566_s21, %s3634_s21  }
   0x4   : > { %s2591_s27 = sadd.s32 1, %s2517_s24   ;;  %s157_s28 = sadd.s32 1, %s2513_s23 }
   0x5   : > { %s154_s29 = ssub.s32 %s2517_s24, %s2591_s27  ;;  %p167_p0 = scmp.ne.s32.totalorder %s2513_s23, %s2509_s22 }
   0x6   : > { %p155_p1 = scmp.eq.s32.totalorder %s154_s29, 0  ;;  %p168_p2 = scmp.eq.s32.totalorder %s2587_s25, 1 }
   0x7   : > { %p173_p3 = scmp.ne.s32.totalorder %s2509_s22, %s2505_s21  ;;  %p174_p4 = scmp.eq.s32.totalorder %s1869_s26, 1 }
   0x8   : > { %s2602_s30 = scalar_select %p155_p1, %s2513_s23, %s157_s28  }
   0x9   : > { %p2604_p5 = por %p168_p2, %p167_p0  ;;  %p2608_p6 = por %p174_p4, %p173_p3 }
   0xa   : > { %p1872_p7 = scmp.ge.s32.totalorder %s2517_s24, 1  ;;  %p216_p8 = scmp.lt.s32.totalorder %s2517_s24, 3 }
   0xc   : > { %p217_p9 = pnand %p1872_p7, %p216_p8 }
   0xe   : > { %220 = sbr.rel (%p217_p9) target bundleno = 1226 (0x4ca), region = 44 }
  0x15   : > { %s1874_s9 = sshll.u32 %s2587_s25, 4  ;;  %v3603_v0 = vmov 4   ;;  %v3609_v1 = vmov 0   ;;  %v3613_v5 = vmov 1   ;;  %v3607_v7 = vmov 2   ;;  %v1183_v34 = vld [vmem:[%s3597_s1] sm:$0xff] }
  0x16   : > { %2372 = vset.pattern.permute.xlu0 %v3603_v0  ;;  %2364 = vset.pattern.permute.xlu1 %v3609_v1  ;;  %p247_p10 = scmp.lt.s32.totalorder %s1874_s9, 31  ;;  %v3614_v16 = vmov 3   ;;  %v3605_v19 = vmov 5   ;;  %v3611_v20 = vmov 6   ;;  %v3616_v22 = vmov 7   ;;  %v1184_v35 = vld [vmem:[%s3597_s1 + $0x8] sm:$0xff] }
  0x17   : > { %v2246_v36 = vpack.c.bf16 %v1184_v35, %v1183_v34  ;;  %v1185_v39 = vld [vmem:[%s3597_s1 + $0x10] sm:$0xff]  ;;  %v1186_v40 = vld [vmem:[%s3597_s1 + $0x18] sm:$0xff]  ;;  %v1187_v43 = vld [vmem:[%s3597_s1 + $0x20] sm:$0xff]  ;;  %v269_v47 = vlaneseq  ;;  %vm1239_vm0 = vcmask 1041408   ;;  %v2527_v54 = vmov 0.0   ;;  %s2044_s16 = sshll.u32 %s2587_s25, 11 }
  0x18   : > { %s3639_s9 = smov (!%p247_p10, %s1874_s9), 31  ;;  %v2250_v41 = vpack.c.bf16 %v1186_v40, %v1185_v39  ;;  %v1188_v44 = vld [vmem:[%s3597_s1 + $0x28] sm:$0xff]  ;;  %v1189_v50 = vld [vmem:[%s3597_s1 + $0x30] sm:$0x3]  ;;  %s3546_s20 = scalar_lea.hbm %s3602_s6, %s2044_s16 }
  0x19   : > { %s1875_s10 = sshll.u32 %s3639_s9, 3  ;;  %2247 = vmatprep.subr.bf16.mxu0 %v2246_v36  ;;  %v2254_v46 = vpack.c.bf16 %v1188_v44, %v1187_v43  ;;  %v2832_v51 = vand.u32 127, %v269_v47 }
  0x1a   : > { %s2620_s13 = scalar_lea.vmem %s3596_s0, %s1875_s10  ;;  %2249 = vmatpush3.bf16.msra.mxu0 %v2246_v36  ;;  %s243_s10 = sand.u32 1, %s2509_s22  }
  0x1b   : > { %v2623_v2 = vld [vmem:[%s2620_s13 + $0x8] sm:$0xff]  ;;  %v2626_v3 = vld [vmem:[%s2620_s13] sm:$0xff]  ;;  %v2631_v4 = vld [vmem:[%s2620_s13 + $0x10] sm:$0xff]  ;;  %2251 = vmatprep.subr.bf16.mxu0 %v2250_v41  ;;  %s1873_s11 = sshll.u32 %s243_s10, 7  ;;  %s3555_s25 = scalar_lea.sflag [#allocation3], %s243_s10 }
  0x1c   : > { %275 = vperm.xlu1 %2364, %v2623_v2   ;;  %720 = vperm.xlu0 %2372, %v2626_v3   ;;  %v2637_v6 = vld [vmem:[%s2620_s13 + $0x18] sm:$0xff]  ;;  %v2642_v8 = vld [vmem:[%s2620_s13 + $0x40] sm:$0xff]  ;;  %v2647_v9 = vld [vmem:[%s2620_s13 + $0x48] sm:$0xff]  ;;  %s3508_s15 = scalar_lea.vmem [#allocation2], %s1873_s11 }
  0x1d   : > { %v2657_v10 = vld [vmem:[%s2620_s13 + $0x20] sm:$0xff]  ;;  %v2663_v11 = vld [vmem:[%s2620_s13 + $0x30] sm:$0xff]  ;;  %v2669_v12 = vld [vmem:[%s2620_s13 + $0x58] sm:$0xff]  ;;  %s1807_s17 = sshll.u32 %s3508_s15, 4  ;;  %s3548_s17 = int_to_ptr.vmem [resolvable:$true] %s1807_s17 }
  0x1e   : > { %v2674_v13 = vld [vmem:[%s2620_s13 + $0x60] sm:$0xff]  ;;  %v2683_v14 = vld [vmem:[%s2620_s13 + $0x38] sm:$0xff]  ;;  %v2691_v15 = vld [vmem:[%s2620_s13 + $0x68] sm:$0xff]  ;;  %2253 = vmatpush3.bf16.msra.mxu0 %v2250_v41  ;;  %s2455_s26 = scalar_lea.vmem %s3548_s17, 2048 }
  0x1f   : > { %v2697_v17 = vld [vmem:[%s2620_s13 + $0x70] sm:$0xff]  ;;  %v2700_v18 = vld [vmem:[%s2620_s13 + $0x28] sm:$0xff]  ;;  %v2734_v21 = vld [vmem:[%s2620_s13 + $0x78] sm:$0xff]  ;;  %2255 = vmatprep.subr.bf16.mxu0 %v2254_v46  ;;  %p2456_p11 = scmp.ne.s32.totalorder %s3548_s17, %s2455_s26 }
  0x20   : > { %2365 = vset.pattern.permute.xlu1 %v3613_v5  ;;  %726 = vperm.xlu0 %2372, %v2631_v4   ;;  %v2852_v61 = vld [vmem:[%s2620_s13 + $0x50] sm:$0xff] }
  0x21   : > { %387 = vperm.xlu1 %2365, %v2623_v2   ;;  %p2457_p12 = pnand %p2456_p11, %p2604_p5 }
  0x22   : > { %2257 = vmatpush3.bf16.msra.mxu0 %v2254_v46 }
  0x23   : > { %2132 = vmatprep.subr.msk.mxu0 %vm1239_vm0, %v1189_v50  ;;  %p2458_p13 = pneg %p2457_p12 }
  0x24   : > { %729 = vperm.xlu0 %2372, %v2637_v6  }
  0x25   : > { %2366 = vset.pattern.permute.xlu1 %v3607_v7 }
  0x26   : > { %496 = vperm.xlu1 %2366, %v2626_v3   ;;  %2133 = vmatpush3.msk.msra.mxu0 %vm1239_vm0, %v1189_v50 }
  0x28   : > { %744 = vperm.xlu0 %2372, %v2642_v8  }
  0x2a   : > { %2367 = vset.pattern.permute.xlu1 %v3609_v1 }
  0x2b   : > { %278 = vperm.xlu1 %2367, %v2631_v4  }
  0x2c   : > { %747 = vperm.xlu0 %2372, %v2647_v9  }
  0x2f   : > { %2368 = vset.pattern.permute.xlu1 %v3613_v5 }
  0x30   : > { %2413 = vset.pattern.permute.xlu0 %v3609_v1  ;;  %390 = vperm.xlu1 %2368, %v2631_v4  }
  0x31   : > { %272 = vperm.xlu0 %2413, %v2626_v3  }
  0x34   : > { %2369 = vset.pattern.permute.xlu1 %v3609_v1 }
  0x35   : > { %284 = vperm.xlu0 %2413, %v2657_v10   ;;  %281 = vperm.xlu1 %2369, %v2637_v6  }
  0x39   : > { %290 = vperm.xlu0 %2413, %v2663_v11   ;;  %2370 = vset.pattern.permute.xlu1 %v3613_v5 }
  0x3a   : > { %393 = vperm.xlu1 %2370, %v2637_v6  }
  0x3d   : > { %305 = vperm.xlu0 %2413, %v2669_v12  }
  0x3e   : > { %2371 = vset.pattern.permute.xlu1 %v3607_v7 }
  0x3f   : > { %502 = vperm.xlu1 %2371, %v2631_v4  }
  0x41   : > { %308 = vperm.xlu0 %2413, %v2674_v13  }
  0x43   : > { %505 = vperm.xlu1 %2371, %v2637_v6  }
  0x45   : > { %2415 = vset.pattern.permute.xlu0 %v3613_v5 }
  0x46   : > { %384 = vperm.xlu0 %2415, %v2626_v3  }
  0x47   : > { %2373 = vset.pattern.permute.xlu1 %v3603_v0 }
  0x48   : > { %723 = vperm.xlu1 %2373, %v2623_v2  }
  0x4a   : > { %405 = vperm.xlu0 %2415, %v2683_v14  }
  0x4c   : > { %2374 = vset.pattern.permute.xlu1 %v3613_v5 }
  0x4d   : > { %396 = vperm.xlu1 %2374, %v2657_v10  }
  0x4e   : > { %408 = vperm.xlu0 %2415, %v2642_v8  }
  0x51   : > { %2375 = vset.pattern.permute.xlu1 %v3614_v16 }
  0x52   : > { %423 = vperm.xlu0 %2415, %v2691_v15   ;;  %614 = vperm.xlu1 %2375, %v2631_v4  }
  0x56   : > { %426 = vperm.xlu0 %2415, %v2697_v17   ;;  %2376 = vset.pattern.permute.xlu1 %v3609_v1 }
  0x57   : > { %287 = vperm.xlu1 %2376, %v2700_v18  }
  0x5a   : > { %2427 = vset.pattern.permute.xlu0 %v3614_v16 }
  0x5b   : > { %608 = vperm.xlu0 %2427, %v2626_v3   ;;  %2377 = vset.pattern.permute.xlu1 %v3613_v5 }
  0x5c   : > { %399 = vperm.xlu1 %2377, %v2700_v18  }
  0x5f   : > { %611 = vperm.xlu0 %2427, %v2623_v2  }
  0x60   : > { %2378 = vset.pattern.permute.xlu1 %v3605_v19 }
  0x61   : > { %835 = vperm.xlu1 %2378, %v2623_v2  }
  0x63   : > { %617 = vperm.xlu0 %2427, %v2637_v6  }
  0x65   : > { %2379 = vset.pattern.permute.xlu1 %v3607_v7 }
  0x66   : > { %508 = vperm.xlu1 %2379, %v2657_v10  }
  0x67   : > { %629 = vperm.xlu0 %2427, %v2683_v14  }
  0x6a   : > { %2380 = vset.pattern.permute.xlu1 %v3611_v20 }
  0x6b   : > { %632 = vperm.xlu0 %2427, %v2642_v8   ;;  %944 = vperm.xlu1 %2380, %v2626_v3  }
  0x6f   : > { %647 = vperm.xlu0 %2427, %v2691_v15   ;;  %2381 = vset.pattern.permute.xlu1 %v3607_v7 }
  0x70   : > { %511 = vperm.xlu1 %2381, %v2700_v18  }
  0x73   : > { %2432 = vset.pattern.permute.xlu0 %v3607_v7 }
  0x74   : > { %499 = vperm.xlu0 %2432, %v2623_v2   ;;  %2382 = vset.pattern.permute.xlu1 %v3611_v20 }
  0x75   : > { %947 = vperm.xlu1 %2382, %v2623_v2  }
  0x78   : > { %520 = vperm.xlu0 %2432, %v2642_v8  }
  0x79   : > { %2383 = vset.pattern.permute.xlu1 %v3613_v5 }
  0x7a   : > { %402 = vperm.xlu1 %2383, %v2663_v11  }
  0x7c   : > { %523 = vperm.xlu0 %2432, %v2647_v9  }
  0x7e   : > { %2384 = vset.pattern.permute.xlu1 %v3614_v16 }
  0x7f   : > { %620 = vperm.xlu1 %2384, %v2657_v10  }
  0x80   : > { %538 = vperm.xlu0 %2432, %v2697_v17  }
  0x83   : > { %2385 = vset.pattern.permute.xlu1 %v3616_v22 }
  0x84   : > { %541 = vperm.xlu0 %2432, %v2734_v21   ;;  %1056 = vperm.xlu1 %2385, %v2626_v3  }
  0x88   : > { %2437 = vset.pattern.permute.xlu0 %v3611_v20  ;;  %2386 = vset.pattern.permute.xlu1 %v3609_v1 }
  0x89   : > { %950 = vperm.xlu0 %2437, %v2631_v4   ;;  %293 = vperm.xlu1 %2386, %v2683_v14  }
  0x8d   : > { %953 = vperm.xlu0 %2437, %v2637_v6   ;;  %2387 = vset.pattern.permute.xlu1 %v3614_v16 }
  0x8e   : > { %623 = vperm.xlu1 %2387, %v2700_v18  }
  0x91   : > { %959 = vperm.xlu0 %2437, %v2700_v18  }
  0x92   : > { %2388 = vset.pattern.permute.xlu1 %v3605_v19 }
  0x93   : > { %841 = vperm.xlu1 %2388, %v2637_v6  }
  0x95   : > { %968 = vperm.xlu0 %2437, %v2642_v8  }
  0x97   : > { %2389 = vset.pattern.permute.xlu1 %v3607_v7 }
  0x98   : > { %514 = vperm.xlu1 %2389, %v2663_v11  }
  0x99   : > { %971 = vperm.xlu0 %2437, %v2647_v9  }
  0x9b   : > { %v2753_v23 = vpop.permute.xlu1 %275  ;;  %v2755_v24 = vpop.permute.xlu0 %720 }
  0x9c   : > { %2390 = vset.pattern.permute.xlu1 %v3603_v0  ;;  %vm767_vm4 = vcmp.eq.s32.totalorder %v2755_v24, %v2832_v51  ;;  %vm320_vm0 = vcmp.eq.s32.totalorder %v2753_v23, %v2832_v51 }
  0x9d   : > { %977 = vperm.xlu0 %2437, %v2669_v12   ;;  %732 = vperm.xlu1 %2390, %v2657_v10   ;;  %v1877_v23 = vsel %vm320_vm0, 1.0, %v2527_v54 }
  0x9f   : > { %v2760_v25 = vpop.permute.xlu0 %726 }
  0xa0   : > { %v2762_v26 = vpop.permute.xlu1 %387 }
  0xa1   : > { %980 = vperm.xlu0 %2437, %v2674_v13   ;;  %2391 = vset.pattern.permute.xlu1 %v3607_v7  ;;  %vm432_vm15 = vcmp.eq.s32.totalorder %v2762_v26, %v2832_v51 }
  0xa2   : > { %517 = vperm.xlu1 %2391, %v2683_v14  }
  0xa3   : > { %v2767_v27 = vpop.permute.xlu0 %729 }
  0xa4   : > { %vm770_vm9 = vcmp.eq.s32.totalorder %v2767_v27, %v2832_v51 }
  0xa5   : > { %2444 = vset.pattern.permute.xlu0 %v3605_v19  ;;  %v2770_v28 = vpop.permute.xlu1 %496  ;;  %v1943_v50 = vsel %vm770_vm9, 1.0, %v2527_v54 }
  0xa6   : > { %832 = vperm.xlu0 %2444, %v2626_v3   ;;  %2392 = vset.pattern.permute.xlu1 %v3603_v0  ;;  %vm543_vm3 = vcmp.eq.s32.totalorder %v2770_v28, %v2832_v51  ;;  %v1940_v28 = vsel %vm767_vm4, 1.0, %v2527_v54 }
  0xa7   : > { %735 = vperm.xlu1 %2392, %v2700_v18   ;;  %v2775_v29 = vpop.permute.xlu0 %744 }
  0xaa   : > { %838 = vperm.xlu0 %2444, %v2631_v4   ;;  %v2778_v30 = vpop.permute.xlu1 %278 }
  0xab   : > { %2393 = vset.pattern.permute.xlu1 %v3609_v1  ;;  %v2781_v31 = vpop.permute.xlu0 %747 }
  0xac   : > { %296 = vperm.xlu1 %2393, %v2642_v8  }
  0xae   : > { %853 = vperm.xlu0 %2444, %v2683_v14  }
  0xaf   : > { %v2785_v32 = vpop.permute.xlu1 %390 }
  0xb0   : > { %2394 = vset.pattern.permute.xlu1 %v3614_v16  ;;  %v273_v33 = vpop.permute.xlu0 %272 }
  0xb1   : > { %626 = vperm.xlu1 %2394, %v2663_v11   ;;  %vm319_vm1 = vcmp.eq.s32.totalorder %v273_v33, %v2832_v51 }
  0xb2   : > { %856 = vperm.xlu0 %2444, %v2642_v8   ;;  %v1876_v55 = vsel %vm319_vm1, 1.0, %v2527_v54 }
  0xb4   : > { %v2796_v37 = vpop.permute.xlu1 %281  ;;  %v2798_v38 = vpop.permute.xlu0 %284 }
  0xb5   : > { %2395 = vset.pattern.permute.xlu1 %v3605_v19  ;;  %vm322_vm7 = vcmp.eq.s32.totalorder %v2796_v37, %v2832_v51 }
  0xb6   : > { %874 = vperm.xlu0 %2444, %v2697_v17   ;;  %844 = vperm.xlu1 %2395, %v2657_v10   ;;  %v1879_v43 = vsel %vm322_vm7, 1.0, %v2527_v54  ;;  %vm775_vm7 = vcmp.eq.s32.totalorder %v2775_v29, %v2832_v51 }
  0xb8   : > { %v2809_v42 = vpop.permute.xlu0 %290 }
  0xb9   : > { %v2817_v45 = vpop.permute.xlu1 %393 }
  0xba   : > { %2446 = vset.pattern.permute.xlu0 %v3616_v22  ;;  %2396 = vset.pattern.permute.xlu1 %v3609_v1  ;;  %vm434_vm5 = vcmp.eq.s32.totalorder %v2817_v45, %v2832_v51 }
  0xbb   : > { %1059 = vperm.xlu0 %2446, %v2623_v2   ;;  %299 = vperm.xlu1 %2396, %v2647_v9   ;;  %v1895_v39 = vsel %vm434_vm5, 1.0, %v2527_v54 }
  0xbc   : > { %v2823_v48 = vpop.permute.xlu0 %305  ;;  %v482_v37 = vadd.f32 %v1895_v39, %v1879_v43 }
  0xbe   : > { %v2825_v49 = vpop.permute.xlu1 %502 }
  0xbf   : > { %1062 = vperm.xlu0 %2446, %v2631_v4   ;;  %2397 = vset.pattern.permute.xlu1 %v3613_v5 }
  0xc0   : > { %411 = vperm.xlu1 %2397, %v2647_v9   ;;  %v2835_v52 = vpop.permute.xlu0 %308 }
  0xc2   : > { %v506_v53 = vpop.permute.xlu1 %505 }
  0xc3   : > { %1077 = vperm.xlu0 %2446, %v2683_v14   ;;  %vm546_vm8 = vcmp.eq.s32.totalorder %v506_v53, %v2832_v51 }
  0xc4   : > { %2398 = vset.pattern.permute.xlu1 %v3605_v19  ;;  %v1911_v44 = vsel %vm546_vm8, 1.0, %v2527_v54  ;;  %vm321_vm8 = vcmp.eq.s32.totalorder %v2778_v30, %v2832_v51 }
  0xc5   : > { %v385_v56 = vpop.permute.xlu0 %384  ;;  %847 = vperm.xlu1 %2398, %v2700_v18   ;;  %v594_v47 = vadd.f32 %v1911_v44, %v482_v37 }
  0xc6   : > { %vm431_vm2 = vcmp.eq.s32.totalorder %v385_v56, %v2832_v51 }
  0xc7   : > { %v1892_v57 = vsel %vm431_vm2, 1.0, %v2527_v54  ;;  %1080 = vperm.xlu0 %2446, %v2642_v8   ;;  %v2845_v58 = vpop.permute.xlu1 %723  ;;  %v1908_v8 = vsel %vm543_vm3, 1.0, %v2527_v54 }
  0xc8   : > { %v479_v59 = vadd.f32 %v1892_v57, %v1876_v55 }
  0xc9   : > { %2399 = vset.pattern.permute.xlu1 %v3616_v22  ;;  %v2848_v60 = vpop.permute.xlu0 %405 }
  0xca   : > { %1065 = vperm.xlu1 %2399, %v2637_v6   ;;  %v591_v34 = vadd.f32 %v1908_v8, %v479_v59  ;;  %vm438_vm11 = vcmp.eq.s32.totalorder %v2848_v60, %v2832_v51 }
  0xcb   : > { %1086 = vperm.xlu0 %2446, %v2852_v61  }
  0xcc   : > { %v2855_v62 = vpop.permute.xlu1 %396 }
  0xcd   : > { %v2857_v63 = vpop.permute.xlu0 %408 }
  0xce   : > { %2400 = vset.pattern.permute.xlu1 %v3603_v0  ;;  %vm439_vm4 = vcmp.eq.s32.totalorder %v2857_v63, %v2832_v51 }
  0xcf   : > { %738 = vperm.xlu1 %2400, %v2663_v11   ;;  %1089 = vperm.xlu0 %2446, %v2669_v12  }
  0xd1   : > { %v2862_v2 = vpop.permute.xlu1 %614  ;;  %v2864_v3 = vpop.permute.xlu0 %423 }
  0xd2   : > { %vm657_vm0 = vcmp.eq.s32.totalorder %v2862_v2, %v2832_v51  ;;  %v1948_v2 = vsel %vm775_vm7, 1.0, %v2527_v54 }
  0xd3   : > { %2401 = vset.pattern.permute.xlu1 %v3611_v20  ;;  %1095 = vperm.xlu0 %2446, %v2691_v15  }
  0xd4   : > { %956 = vperm.xlu1 %2401, %v2657_v10  }
  0xd5   : > { %v2869_v4 = vpop.permute.xlu0 %426 }
  0xd6   : > { %v2871_v6 = vpop.permute.xlu1 %287 }
  0xd7   : > { %1098 = vperm.xlu0 %2446, %v2697_v17  }
  0xd8   : > { %2402 = vset.pattern.permute.xlu1 %v3603_v0 }
  0xd9   : > { %741 = vperm.xlu1 %2402, %v2683_v14  }
  0xda   : > { %v609_v33 = vpop.permute.xlu0 %608 }
  0xdb   : > { %vm655_vm6 = vcmp.eq.s32.totalorder %v609_v33, %v2832_v51  ;;  %v2884_v35 = vpop.permute.xlu1 %399 }
  0xdc   : > { %v1924_v36 = vsel %vm655_vm6, 1.0, %v2527_v54 }
  0xdd   : > { %v703_v24 = vadd.f32 %v1924_v36, %v591_v34  ;;  %2403 = vset.pattern.permute.xlu1 %v3609_v1 }
  0xde   : > { %v2893_v40 = vpop.permute.xlu0 %611  ;;  %302 = vperm.xlu1 %2403, %v2852_v61  }
  0xdf   : > { %v2896_v41 = vadd.f32 %v1940_v28, %v703_v24  ;;  %vm656_vm6 = vcmp.eq.s32.totalorder %v2893_v40, %v2832_v51  ;;  %v1900_v40 = vsel %vm439_vm4, 1.0, %v2527_v54 }
  0xe0   : > { %v2900_v45 = vpop.permute.xlu1 %835 }
  0xe1   : > { %vm880_vm4 = vcmp.eq.s32.totalorder %v2900_v45, %v2832_v51 }
  0xe2   : > { %v618_v46 = vpop.permute.xlu0 %617  ;;  %2404 = vset.pattern.permute.xlu1 %v3613_v5 }
  0xe3   : > { %vm658_vm10 = vcmp.eq.s32.totalorder %v618_v46, %v2832_v51  ;;  %414 = vperm.xlu1 %2404, %v2852_v61  }
  0xe4   : > { %v1927_v53 = vsel %vm658_vm10, 1.0, %v2527_v54  ;;  %vm433_vm10 = vcmp.eq.s32.totalorder %v2785_v32, %v2832_v51 }
  0xe5   : > { %v706_v55 = vadd.f32 %v1927_v53, %v594_v47  ;;  %v2909_v56 = vpop.permute.xlu1 %508 }
  0xe6   : > { %v630_v57 = vpop.permute.xlu0 %629 }
  0xe7   : > { %v2911_v59 = vadd.f32 %v1943_v50, %v706_v55  ;;  %2405 = vset.pattern.permute.xlu1 %v3605_v19  ;;  %vm662_vm13 = vcmp.eq.s32.totalorder %v630_v57, %v2832_v51  ;;  %v1893_v57 = vsel %vm432_vm15, 1.0, %v2527_v54  ;;  %vm768_vm15 = vcmp.eq.s32.totalorder %v2845_v58, %v2832_v51 }
  0xe8   : > { %850 = vperm.xlu1 %2405, %v2663_v11  }
  0xea   : > { %v2915_v27 = vpop.permute.xlu1 %944  ;;  %v2917_v8 = vpop.permute.xlu0 %632 }
  0xeb   : > { %vm991_vm2 = vcmp.eq.s32.totalorder %v2915_v27, %v2832_v51 }
  0xec   : > { %2406 = vset.pattern.permute.xlu1 %v3616_v22 }
  0xed   : > { %1068 = vperm.xlu1 %2406, %v2657_v10  }
  0xee   : > { %v2921_v33 = vpop.permute.xlu0 %647 }
  0xef   : > { %v2923_v34 = vpop.permute.xlu1 %511 }
  0xf1   : > { %2407 = vset.pattern.permute.xlu1 %v3613_v5 }
  0xf2   : > { %417 = vperm.xlu1 %2407, %v2669_v12  }
  0xf3   : > { %v2927_v28 = vpop.permute.xlu0 %499 }
  0xf4   : > { %v2929_v36 = vpop.permute.xlu1 %947  ;;  %vm544_vm1 = vcmp.eq.s32.totalorder %v2927_v28, %v2832_v51 }
  0xf5   : > { %v1909_v28 = vsel %vm544_vm1, 1.0, %v2527_v54  ;;  %vm769_vm1 = vcmp.eq.s32.totalorder %v2760_v25, %v2832_v51 }
  0xf6   : > { %2408 = vset.pattern.permute.xlu1 %v3614_v16  ;;  %v1942_v45 = vsel %vm769_vm1, 1.0, %v2527_v54 }
  0xf7   : > { %635 = vperm.xlu1 %2408, %v2647_v9   ;;  %v2933_v24 = vpop.permute.xlu0 %520 }
  0xf8   : > { %vm551_vm9 = vcmp.eq.s32.totalorder %v2933_v24, %v2832_v51 }
  0xf9   : > { %v2935_v39 = vpop.permute.xlu1 %402  ;;  %v1916_v24 = vsel %vm551_vm9, 1.0, %v2527_v54 }
  0xfa   : > { %vm437_vm1 = vcmp.eq.s32.totalorder %v2935_v39, %v2832_v51 }
  0xfb   : > { %2409 = vset.pattern.permute.xlu1 %v3616_v22  ;;  %v2938_v10 = vpop.permute.xlu0 %523 }
  0xfc   : > { %1071 = vperm.xlu1 %2409, %v2700_v18   ;;  %vm552_vm9 = vcmp.eq.s32.totalorder %v2938_v10, %v2832_v51 }
  0xfe   : > { %v2941_v43 = vpop.permute.xlu1 %620 }
  0xff   : > { %v2943_v44 = vpop.permute.xlu0 %538 }
 0x100   : > { %3620 = vst [vmem:[#allocation5_spill] sm:$0xff] %v2943_v44  ;;  %2410 = vset.pattern.permute.xlu1 %v3607_v7 }
 0x101   : > { %526 = vperm.xlu1 %2410, %v2852_v61  }
 0x103   : > { %v2947_v37 = vpop.permute.xlu1 %1056  ;;  %v2949_v46 = vpop.permute.xlu0 %541 }
 0x104   : > { %3621 = vst [vmem:[#allocation6_spill] sm:$0xff] %v2949_v46  ;;  %vm1103_vm5 = vcmp.eq.s32.totalorder %v2947_v37, %v2832_v51 }
 0x105   : > { %2411 = vset.pattern.permute.xlu1 %v3611_v20  ;;  %v1988_v37 = vsel %vm1103_vm5, 1.0, %v2527_v54 }
 0x106   : > { %962 = vperm.xlu1 %2411, %v2663_v11  }
 0x108   : > { %v294_v47 = vpop.permute.xlu1 %293  ;;  %v2953_v50 = vpop.permute.xlu0 %950 }
 0x109   : > { %vm326_vm12 = vcmp.eq.s32.totalorder %v294_v47, %v2832_v51  ;;  %v1931_v47 = vsel %vm662_vm13, 1.0, %v2527_v54  ;;  %vm545_vm13 = vcmp.eq.s32.totalorder %v2825_v49, %v2832_v51  ;;  %vm993_vm7 = vcmp.eq.s32.totalorder %v2953_v50, %v2832_v51 }
 0x10a   : > { %2412 = vset.pattern.permute.xlu1 %v3607_v7  ;;  %v1883_v46 = vsel %vm326_vm12, 1.0, %v2527_v54 }
 0x10b   : > { %529 = vperm.xlu1 %2412, %v2669_v12  }
 0x10c   : > { %v2957_v18 = vpop.permute.xlu0 %953 }
 0x10d   : > { %v2959_v53 = vpop.permute.xlu1 %623 }
 0x10f   : > { %2414 = vset.pattern.permute.xlu1 %v3611_v20 }
 0x110   : > { %965 = vperm.xlu1 %2414, %v2683_v14   ;;  %v2963_v55 = vpop.permute.xlu0 %959 }
 0x112   : > { %v2965_v0 = vpop.permute.xlu1 %841 }
 0x114   : > { %2416 = vset.pattern.permute.xlu1 %v3613_v5  ;;  %v2968_v19 = vpop.permute.xlu0 %968  ;;  %v1899_v5 = vsel %vm438_vm11, 1.0, %v2527_v54  ;;  %vm663_vm11 = vcmp.eq.s32.totalorder %v2917_v8, %v2832_v51 }
 0x115   : > { %420 = vperm.xlu1 %2416, %v2674_v13   ;;  %v486_v60 = vadd.f32 %v1899_v5, %v1883_v46  ;;  %v3624_v46 = vmov 3   ;;  %v1932_v49 = vsel %vm663_vm11, 1.0, %v2527_v54 }
 0x117   : > { %v2971_v7 = vpop.permute.xlu1 %514 }
 0x118   : > { %v2973_v1 = vpop.permute.xlu0 %971 }
 0x119   : > { %2417 = vset.pattern.permute.xlu1 %v3614_v16 }
 0x11a   : > { %638 = vperm.xlu1 %2417, %v2852_v61  }
 0x11c   : > { %v2980_v14 = vpop.permute.xlu1 %732  ;;  %v2982_v20 = vpop.permute.xlu0 %977 }
 0x11d   : > { %3622 = vst [vmem:[#allocation7_spill] sm:$0xff] %v2982_v20  ;;  %v3623_v20 = vmov 0  }
 0x11e   : > { %2418 = vset.pattern.permute.xlu1 %v3616_v22 }
 0x11f   : > { %1074 = vperm.xlu1 %2418, %v2663_v11  }
 0x120   : > { %v2989_v16 = vpop.permute.xlu0 %980 }
 0x121   : > { %v518_v44 = vpop.permute.xlu1 %517 }
 0x122   : > { %vm550_vm14 = vcmp.eq.s32.totalorder %v518_v44, %v2832_v51 }
 0x123   : > { %v1915_v22 = vsel %vm550_vm14, 1.0, %v2527_v54  ;;  %2419 = vset.pattern.permute.xlu1 %v3623_v20  ;;  %vm1190_vm14 = vcmask 408576  }
 0x124   : > { %v598_v11 = vadd.f32 %v1915_v22, %v486_v60  ;;  %311 = vperm.xlu1 %2419, %v2691_v15   ;;  %v480_v60 = vadd.f32 %v1893_v57, %v1877_v23  ;;  %v1925_v57 = vsel %vm656_vm6, 1.0, %v2527_v54  ;;  %vm992_vm6 = vcmp.eq.s32.totalorder %v2929_v36, %v2832_v51 }
 0x125   : > { %v833_v5 = vpop.permute.xlu0 %832  ;;  %v1974_v36 = vsel %vm993_vm7, 1.0, %v2527_v54 }
 0x126   : > { %vm879_vm3 = vcmp.eq.s32.totalorder %v833_v5, %v2832_v51  ;;  %v3006_v26 = vpop.permute.xlu1 %735  ;;  %v3008_v44 = vadd.f32 %v1931_v47, %v598_v11  ;;  %v1972_v47 = vsel %vm991_vm2, 1.0, %v2527_v54  ;;  %vm999_vm2 = vcmp.eq.s32.totalorder %v2968_v19, %v2832_v51 }
 0x127   : > { %v1956_v22 = vsel %vm879_vm3, 1.0, %v2527_v54 }
 0x128   : > { %v927_v27 = vadd.f32 %v1956_v22, %v2896_v41  ;;  %2420 = vset.pattern.permute.xlu1 %v3624_v46  ;;  %v592_v41 = vadd.f32 %v1909_v28, %v480_v60  ;;  %v3625_v22 = vmov 5  }
 0x129   : > { %v839_v11 = vpop.permute.xlu0 %838  ;;  %641 = vperm.xlu1 %2420, %v2669_v12  }
 0x12a   : > { %v1039_v63 = vadd.f32 %v1972_v47, %v927_v27  ;;  %v1894_v27 = vsel %vm433_vm10, 1.0, %v2527_v54  ;;  %v704_v47 = vadd.f32 %v1925_v57, %v592_v41  ;;  %v1941_v41 = vsel %vm768_vm15, 1.0, %v2527_v54 }
 0x12b   : > { %v297_v5 = vpop.permute.xlu1 %296  ;;  %v1926_v57 = vsel %vm657_vm0, 1.0, %v2527_v54  ;;  %vm881_vm5 = vcmp.eq.s32.totalorder %v839_v11, %v2832_v51  ;;  %vm994_vm15 = vcmp.eq.s32.totalorder %v2957_v18, %v2832_v51  ;;  %vm325_vm0 = vcmp.eq.s32.totalorder %v2809_v42, %v2832_v51 }
 0x12c   : > { %vm327_vm12 = vcmp.eq.s32.totalorder %v297_v5, %v2832_v51  ;;  %v1151_v23 = vadd.f32 %v1988_v37, %v1039_v63  ;;  %v1878_v63 = vsel %vm321_vm8, 1.0, %v2527_v54  ;;  %v1910_v37 = vsel %vm545_vm13, 1.0, %v2527_v54 }
 0x12d   : > { %v1884_v32 = vsel %vm327_vm12, 1.0, %v2527_v54  ;;  %2421 = vset.pattern.permute.xlu1 %v3625_v22  ;;  %v3042_v28 = vpop.permute.xlu0 %853  ;;  %v816_v29 = vadd.f32 %v1941_v41, %v704_v47  ;;  %v1957_v47 = vsel %vm880_vm4, 1.0, %v2527_v54  ;;  %v1958_v11 = vsel %vm881_vm5, 1.0, %v2527_v54 }
 0x12e   : > { %v487_v8 = vadd.f32 %v1900_v40, %v1884_v32  ;;  %859 = vperm.xlu1 %2421, %v2647_v9   ;;  %v1167_v60 = vmul.f32 0.125, %v1151_v23  ;;  %v481_v40 = vadd.f32 %v1894_v27, %v1878_v63  ;;  %v1980_v63 = vsel %vm999_vm2, 1.0, %v2527_v54 }
 0x12f   : > { %v1973_v41 = vsel %vm992_vm6, 1.0, %v2527_v54  ;;  %vm882_vm12 = vcmp.eq.s32.totalorder %v2965_v0, %v2832_v51  ;;  %vm549_vm2 = vcmp.eq.s32.totalorder %v2971_v7, %v2832_v51  ;;  %v1882_v18 = vsel %vm325_vm0, 1.0, %v2527_v54 }
 0x130   : > { %v599_v5 = vadd.f32 %v1916_v24, %v487_v8  ;;  %2134 = vmatprep.mubr.msk.f32.mxu0 %vm1190_vm14, %v1167_v60  ;;  %v3057_v58 = vpop.permute.xlu1 %626  ;;  %v3626_v24 = vmov 2   ;;  %v593_v32 = vadd.f32 %v1910_v37, %v481_v40  ;;  %v1959_v0 = vsel %vm882_vm12, 1.0, %v2527_v54 }
 0x131   : > { %v857_v30 = vpop.permute.xlu0 %856  ;;  %v1898_v42 = vsel %vm437_vm1, 1.0, %v2527_v54  ;;  %vm886_vm6 = vcmp.eq.s32.totalorder %v3042_v28, %v2832_v51 }
 0x132   : > { %v711_v23 = vadd.f32 %v1932_v49, %v599_v5  ;;  %vm887_vm3 = vcmp.eq.s32.totalorder %v857_v30, %v2832_v51  ;;  %2422 = vset.pattern.permute.xlu1 %v3626_v24  ;;  %v705_v60 = vadd.f32 %v1926_v57, %v593_v32  ;;  %v928_v5 = vadd.f32 %v1957_v47, %v816_v29 }
 0x133   : > { %v1964_v27 = vsel %vm887_vm3, 1.0, %v2527_v54  ;;  %532 = vperm.xlu1 %2422, %v2674_v13   ;;  %vm661_vm3 = vcmp.eq.s32.totalorder %v3057_v58, %v2832_v51 }
 0x134   : > { %v823_v8 = vadd.f32 %v1948_v2, %v711_v23  ;;  %v3627_v2 = vmov 4   ;;  %v817_v25 = vadd.f32 %v1942_v45, %v705_v60  ;;  %v1040_v23 = vadd.f32 %v1973_v41, %v928_v5 }
 0x135   : > { %v3077_v19 = vpop.permute.xlu1 %844  ;;  %v3079_v49 = vpop.permute.xlu0 %874  ;;  %v1930_v7 = vsel %vm661_vm3, 1.0, %v2527_v54  ;;  %vm324_vm3 = vcmp.eq.s32.totalorder %v2871_v6, %v2832_v51 }
 0x136   : > { %v935_v37 = vadd.f32 %v1964_v27, %v823_v8  ;;  %v929_v32 = vadd.f32 %v1958_v11, %v817_v25  ;;  %vm883_vm0 = vcmp.eq.s32.totalorder %v3077_v19, %v2832_v51  ;;  %v1881_v6 = vsel %vm324_vm3, 1.0, %v2527_v54 }
 0x137   : > { %2423 = vset.pattern.permute.xlu1 %v3627_v2 }
 0x138   : > { %750 = vperm.xlu1 %2423, %v2852_v61   ;;  %v3091_v40 = vadd.f32 %v1980_v63, %v935_v37  ;;  %v1041_v60 = vadd.f32 %v1974_v36, %v929_v32  ;;  %v485_v32 = vadd.f32 %v1898_v42, %v1882_v18 }
 0x13a   : > { %v1060_v30 = vpop.permute.xlu0 %1059  ;;  %v300_v57 = vpop.permute.xlu1 %299 }
 0x13b   : > { %vm1104_vm8 = vcmp.eq.s32.totalorder %v1060_v30, %v2832_v51  ;;  %vm328_vm10 = vcmp.eq.s32.totalorder %v300_v57, %v2832_v51  ;;  %v930_v30 = vadd.f32 %v1959_v0, %v2911_v59  ;;  %v1975_v57 = vsel %vm994_vm15, 1.0, %v2527_v54 }
 0x13c   : > { %v1989_v29 = vsel %vm1104_vm8, 1.0, %v2527_v54  ;;  %2424 = vset.pattern.permute.xlu1 %v3626_v24  ;;  %v1917_v24 = vsel %vm552_vm9, 1.0, %v2527_v54  ;;  %v1885_v47 = vsel %vm328_vm10, 1.0, %v2527_v54  ;;  %vm323_vm8 = vcmp.eq.s32.totalorder %v2798_v38, %v2832_v51 }
 0x13d   : > { %v1152_v27 = vadd.f32 %v1989_v29, %v1040_v23  ;;  %535 = vperm.xlu1 %2424, %v2691_v15   ;;  %v1914_v23 = vsel %vm549_vm2, 1.0, %v2527_v54  ;;  %v1042_v59 = vadd.f32 %v1975_v57, %v930_v30  ;;  %vm435_vm9 = vcmp.eq.s32.totalorder %v2855_v62, %v2832_v51 }
 0x13e   : > { %v1063_v50 = vpop.permute.xlu0 %1062  ;;  %vm547_vm10 = vcmp.eq.s32.totalorder %v2909_v56, %v2832_v51  ;;  %v1880_v0 = vsel %vm323_vm8, 1.0, %v2527_v54  ;;  %v3629_v57 = vmov 7   ;;  %vm436_vm2 = vcmp.eq.s32.totalorder %v2884_v35, %v2832_v51 }
 0x13f   : > { %v1168_v8 = vmul.f32 0.125, %v1152_v27  ;;  %vm1105_vm11 = vcmp.eq.s32.totalorder %v1063_v50, %v2832_v51  ;;  %v412_v63 = vpop.permute.xlu1 %411  ;;  %v597_v27 = vadd.f32 %v1914_v23, %v485_v32  ;;  %v1912_v38 = vsel %vm547_vm10, 1.0, %v2527_v54 }
 0x140   : > { %v1990_v45 = vsel %vm1105_vm11, 1.0, %v2527_v54  ;;  %vm440_vm13 = vcmp.eq.s32.totalorder %v412_v63, %v2832_v51  ;;  %vm659_vm11 = vcmp.eq.s32.totalorder %v2941_v43, %v2832_v51  ;;  %v1960_v23 = vsel %vm883_vm0, 1.0, %v2527_v54 }
 0x141   : > { %v1153_v10 = vadd.f32 %v1990_v45, %v1041_v60  ;;  %v1901_v37 = vsel %vm440_vm13, 1.0, %v2527_v54  ;;  %2425 = vset.pattern.permute.xlu1 %v3627_v2  ;;  %2135 = vmatmul.mubr.msk.f32.vlgmr.msra.gmra.mrb[0].mxu0 %vm1190_vm14, %v1168_v8  ;;  %v709_v58 = vadd.f32 %v1930_v7, %v597_v27  ;;  %vm771_vm13 = vcmp.eq.s32.totalorder %v2980_v14, %v2832_v51 }
 0x142   : > { %v488_v5 = vadd.f32 %v1901_v37, %v1885_v47  ;;  %753 = vperm.xlu1 %2425, %v2669_v12   ;;  %v1963_v47 = vsel %vm886_vm6, 1.0, %v2527_v54  ;;  %v3628_v37 = vmov 1   ;;  %v1928_v56 = vsel %vm659_vm11, 1.0, %v2527_v54 }
 0x143   : > { %v1169_v11 = vmul.f32 0.125, %v1153_v10  ;;  %v1944_v14 = vsel %vm771_vm13, 1.0, %v2527_v54  ;;  %vm330_vm6 = vcmp.eq.s32.totalorder %v2823_v48, %v2832_v51  ;;  %v3630_v35 = vmov 6  }
 0x144   : > { %v3118_v25 = vpop.permute.xlu1 %847  ;;  %v3120_v41 = vadd.f32 %v1917_v24, %v488_v5  ;;  %vm772_vm8 = vcmp.eq.s32.totalorder %v3006_v26, %v2832_v51  ;;  %v1887_v48 = vsel %vm330_vm6, 1.0, %v2527_v54  ;;  %vm996_vm11 = vcmp.eq.s32.totalorder %v2963_v55, %v2832_v51 }
 0x145   : > { %2137 = vmatprep.mubr.msk.f32.mxu0 %vm1190_vm14, %v1169_v11 }
 0x146   : > { %2426 = vset.pattern.permute.xlu1 %v3623_v20 }
 0x147   : > { %314 = vperm.xlu1 %2426, %v2697_v17  }
 0x149   : > { %v1066_v39 = vpop.permute.xlu1 %1065 }
 0x14a   : > { %vm1106_vm4 = vcmp.eq.s32.totalorder %v1066_v39, %v2832_v51 }
 0x14b   : > { %v1991_v36 = vsel %vm1106_vm4, 1.0, %v2527_v54  ;;  %2428 = vset.pattern.permute.xlu1 %v3624_v46  ;;  %vm548_vm4 = vcmp.eq.s32.totalorder %v2923_v34, %v2832_v51 }
 0x14c   : > { %v1154_v29 = vadd.f32 %v1991_v36, %v1042_v59  ;;  %644 = vperm.xlu1 %2428, %v2674_v13   ;;  %v1897_v36 = vsel %vm436_vm2, 1.0, %v2527_v54  ;;  %v1913_v34 = vsel %vm548_vm4, 1.0, %v2527_v54  ;;  %vm331_vm2 = vcmp.eq.s32.totalorder %v2835_v52, %v2832_v51 }
 0x14d   : > { %v484_v27 = vadd.f32 %v1897_v36, %v1881_v6  ;;  %v2453_v6 = vld [vmem:[%s2620_s13 + $0x68] sm:$0xff] }
 0x14e   : > { %v1170_v50 = vmul.f32 0.125, %v1154_v29  ;;  %v739_v8 = vpop.permute.xlu1 %738 }
 0x14f   : > { %vm773_vm5 = vcmp.eq.s32.totalorder %v739_v8, %v2832_v51 }
 0x150   : > { %v1946_v60 = vsel %vm773_vm5, 1.0, %v2527_v54  ;;  %2429 = vset.pattern.permute.xlu1 %v3625_v22  ;;  %2138 = vmatmul.mubr.msk.f32.gmra.mrb[2].mxu0 %vm1190_vm14, %v1170_v50 }
 0x151   : > { %v3147_v63 = vadd.f32 %v1946_v60, %v709_v58  ;;  %862 = vperm.xlu1 %2429, %v2852_v61   ;;  %v596_v58 = vadd.f32 %v1913_v34, %v484_v27  ;;  %v1945_v60 = vsel %vm772_vm8, 1.0, %v2527_v54 }
 0x153   : > { %v957_v45 = vpop.permute.xlu1 %956 }
 0x154   : > { %vm995_vm1 = vcmp.eq.s32.totalorder %v957_v45, %v2832_v51 }
 0x155   : > { %2430 = vset.pattern.permute.xlu1 %v3623_v20  ;;  %v1976_v19 = vsel %vm995_vm1, 1.0, %v2527_v54 }
 0x156   : > { %317 = vperm.xlu1 %2430, %v2734_v21  }
 0x158   : > { %v742_v24 = vpop.permute.xlu1 %741 }
 0x159   : > { %vm774_vm7 = vcmp.eq.s32.totalorder %v742_v24, %v2832_v51 }
 0x15a   : > { %v1947_v10 = vsel %vm774_vm7, 1.0, %v2527_v54  ;;  %2431 = vset.pattern.permute.xlu1 %v3628_v37  ;;  %vm660_vm7 = vcmp.eq.s32.totalorder %v2959_v53, %v2832_v51 }
 0x15b   : > { %v822_v5 = vadd.f32 %v1947_v10, %v3008_v44  ;;  %429 = vperm.xlu1 %2431, %v2734_v21   ;;  %v1896_v44 = vsel %vm435_vm9, 1.0, %v2527_v54  ;;  %v1929_v50 = vsel %vm660_vm7, 1.0, %v2527_v54  ;;  %vm884_vm9 = vcmp.eq.s32.totalorder %v3118_v25, %v2832_v51 }
 0x15c   : > { %v483_v11 = vadd.f32 %v1896_v44, %v1880_v0  ;;  %v708_v26 = vadd.f32 %v1929_v50, %v596_v58  ;;  %v1961_v24 = vsel %vm884_vm9, 1.0, %v2527_v54 }
 0x15d   : > { %v303_v20 = vpop.permute.xlu1 %302  ;;  %v3164_v28 = vadd.f32 %v1963_v47, %v822_v5  ;;  %v1977_v5 = vsel %vm996_vm11, 1.0, %v2527_v54  ;;  %vm444_vm11 = vcmp.eq.s32.totalorder %v2864_v3, %v2832_v51 }
 0x15e   : > { %vm329_vm12 = vcmp.eq.s32.totalorder %v303_v20, %v2832_v51  ;;  %v595_v43 = vadd.f32 %v1912_v38, %v483_v11  ;;  %v820_v25 = vadd.f32 %v1945_v60, %v708_v26  ;;  %v2451_v11 = vld [vmem:[%s2620_s13 + $0x60] sm:$0xff] }
 0x15f   : > { %2433 = vset.pattern.permute.xlu1 %v3625_v22  ;;  %v1886_v30 = vsel %vm329_vm12, 1.0, %v2527_v54  ;;  %vm776_vm12 = vcmp.eq.s32.totalorder %v2781_v31, %v2832_v51 }
 0x160   : > { %865 = vperm.xlu1 %2433, %v2669_v12   ;;  %v707_v42 = vadd.f32 %v1928_v56, %v595_v43  ;;  %v932_v10 = vadd.f32 %v1961_v24, %v820_v25  ;;  %v1949_v55 = vsel %vm776_vm12, 1.0, %v2527_v54  ;;  %v2454_v25 = vld [vmem:[%s2620_s13 + $0x78] sm:$0xff] }
 0x162   : > { %v415_v62 = vpop.permute.xlu1 %414  ;;  %v819_v59 = vadd.f32 %v1944_v14, %v707_v42  ;;  %v1044_v31 = vadd.f32 %v1977_v5, %v932_v10 }
 0x163   : > { %vm441_vm15 = vcmp.eq.s32.totalorder %v415_v62, %v2832_v51 }
 0x164   : > { %v1902_v12 = vsel %vm441_vm15, 1.0, %v2527_v54  ;;  %2434 = vset.pattern.permute.xlu1 %v3629_v57 }
 0x165   : > { %v3185_v18 = vadd.f32 %v1902_v12, %v1886_v30  ;;  %1083 = vperm.xlu1 %2434, %v2647_v9   ;;  %v931_v9 = vadd.f32 %v1960_v23, %v819_v59  ;;  %v2452_v23 = vld [vmem:[%s2620_s13 + $0x70] sm:$0xff]  ;;  %s2528_s13 = smov [#allocation2]  }
 0x166   : > { %s2459_s28 = sshll.u32 %s2528_s13, 4  ;;  %s2460_s28 = int_to_ptr.vmem [resolvable:$false] %s2459_s28 }
 0x167   : > { %v3190_v39 = vpop.permute.xlu1 %850  ;;  %v1043_v7 = vadd.f32 %v1976_v19, %v931_v9  ;;  %v1391_v19 = vld [vmem:[%s3598_s2 + $0x18] sm:$0xff]  ;;  %s2461_s29 = scalar_lea.vmem %s2460_s28, 4096  ;;  %p2462_p0 = scmp.lt.s32.totalorder %s3548_s17, %s2460_s28 }
 0x168   : > { %p2463_p1 = scmp.lt.s32.totalorder %s2461_s29, %s2455_s26 }
 0x169   : > { %2435 = vset.pattern.permute.xlu1 %v3627_v2 }
 0x16a   : > { %756 = vperm.xlu1 %2435, %v2674_v13   ;;  %p2464_p2 = por %p2463_p1, %p2462_p0 }
 0x16c   : > { %v1069_v32 = vpop.permute.xlu1 %1068  ;;  %p2465_p3 = pnand %p2464_p2, %p2458_p13 }
 0x16d   : > { %vm1107_vm5 = vcmp.eq.s32.totalorder %v1069_v32, %v2832_v51  ;;  %v1078_v32 = vpop.permute.xlu0 %1077 }
 0x16e   : > { %v1992_v13 = vsel %vm1107_vm5, 1.0, %v2527_v54  ;;  %2436 = vset.pattern.permute.xlu1 %v3630_v35  ;;  %vm885_vm5 = vcmp.eq.s32.totalorder %v3190_v39, %v2832_v51  ;;  %vm1110_vm7 = vcmp.eq.s32.totalorder %v1078_v32, %v2832_v51 }
 0x16f   : > { %v1155_v29 = vadd.f32 %v1992_v13, %v1043_v7  ;;  %974 = vperm.xlu1 %2436, %v2852_v61   ;;  %v1888_v7 = vsel %vm331_vm2, 1.0, %v2527_v54  ;;  %v1962_v27 = vsel %vm885_vm5, 1.0, %v2527_v54 }
 0x170   : > { %v933_v58 = vadd.f32 %v1962_v27, %v3147_v63 }
 0x171   : > { %v1171_v53 = vmul.f32 0.125, %v1155_v29  ;;  %v418_v8 = vpop.permute.xlu1 %417  ;;  %v1081_v52 = vpop.permute.xlu0 %1080 }
 0x172   : > { %vm442_vm10 = vcmp.eq.s32.totalorder %v418_v8, %v2832_v51  ;;  %vm1111_vm9 = vcmp.eq.s32.totalorder %v1081_v52, %v2832_v51  ;;  %v1995_v8 = vsel %vm1110_vm7, 1.0, %v2527_v54 }
 0x173   : > { %v1903_v61 = vsel %vm442_vm10, 1.0, %v2527_v54  ;;  %2438 = vset.pattern.permute.xlu1 %v3627_v2  ;;  %2140 = vmatprep.mubr.msk.f32.mxu0 %vm1190_vm14, %v1171_v53  ;;  %v1996_v60 = vsel %vm1111_vm9, 1.0, %v2527_v54 }
 0x174   : > { %v490_v45 = vadd.f32 %v1903_v61, %v1887_v48  ;;  %759 = vperm.xlu1 %2438, %v2691_v15  }
 0x176   : > { %v636_v47 = vpop.permute.xlu1 %635 }
 0x177   : > { %vm664_vm13 = vcmp.eq.s32.totalorder %v636_v47, %v2832_v51 }
 0x178   : > { %v1933_v37 = vsel %vm664_vm13, 1.0, %v2527_v54  ;;  %2439 = vset.pattern.permute.xlu1 %v3624_v46  ;;  %vm1000_vm13 = vcmp.eq.s32.totalorder %v2973_v1, %v2832_v51 }
 0x179   : > { %v712_v20 = vadd.f32 %v1933_v37, %v3120_v41  ;;  %650 = vperm.xlu1 %2439, %v2697_v17  }
 0x17b   : > { %v1072_v0 = vpop.permute.xlu1 %1071  ;;  %v3237_v44 = vadd.f32 %v1949_v55, %v712_v20  ;;  %v1981_v55 = vsel %vm1000_vm13, 1.0, %v2527_v54 }
 0x17c   : > { %vm1108_vm15 = vcmp.eq.s32.totalorder %v1072_v0, %v2832_v51 }
 0x17d   : > { %v1993_v38 = vsel %vm1108_vm15, 1.0, %v2527_v54  ;;  %2440 = vset.pattern.permute.xlu1 %v3625_v22 }
 0x17e   : > { %v1156_v62 = vadd.f32 %v1993_v38, %v1044_v31  ;;  %868 = vperm.xlu1 %2440, %v2451_v11  }
 0x180   : > { %v1172_v56 = vmul.f32 0.125, %v1156_v62  ;;  %v527_v30 = vpop.permute.xlu1 %526 }
 0x181   : > { %vm553_vm0 = vcmp.eq.s32.totalorder %v527_v30, %v2832_v51 }
 0x182   : > { %v1918_v17 = vsel %vm553_vm0, 1.0, %v2527_v54  ;;  %2441 = vset.pattern.permute.xlu1 %v3624_v46  ;;  %2141 = vmatmul.mubr.msk.f32.gmra.mrb[4].mxu0 %vm1190_vm14, %v1172_v56  ;;  %v1388_v46 = vld [vmem:[%s3598_s2] sm:$0xff] }
 0x183   : > { %v601_v41 = vadd.f32 %v1918_v17, %v3185_v18  ;;  %653 = vperm.xlu1 %2441, %v2734_v21   ;;  %v1389_v18 = vld [vmem:[%s3598_s2 + $0x8] sm:$0xff] }
 0x185   : > { %v963_v12 = vpop.permute.xlu1 %962 }
 0x186   : > { %vm997_vm6 = vcmp.eq.s32.totalorder %v963_v12, %v2832_v51 }
 0x187   : > { %2442 = vset.pattern.permute.xlu1 %v3625_v22  ;;  %v1978_v48 = vsel %vm997_vm6, 1.0, %v2527_v54 }
 0x188   : > { %871 = vperm.xlu1 %2442, %v2691_v15   ;;  %v2258_v15 = vpack.c.bf16 %v1389_v18, %v1388_v46  ;;  %v1045_v26 = vadd.f32 %v1978_v48, %v933_v58  ;;  %v3633_v48 = vld [vmem:[#allocation7_spill] sm:$0xff] }
 0x18a   : > { %v530_v43 = vpop.permute.xlu1 %529  ;;  %2259 = vmatprep.subr.bf16.mxu1 %v2258_v15 }
 0x18b   : > { %vm554_vm1 = vcmp.eq.s32.totalorder %v530_v43, %v2832_v51  ;;  %2261 = vmatpush3.bf16.msra.mxu1 %v2258_v15  ;;  %v3631_v43 = vld [vmem:[#allocation5_spill] sm:$0xff] }
 0x18c   : > { %v1919_v14 = vsel %vm554_vm1, 1.0, %v2527_v54  ;;  %2443 = vset.pattern.permute.xlu1 %v3627_v2  ;;  %v1390_v2 = vld [vmem:[%s3598_s2 + $0x10] sm:$0xff]  ;;  %vm668_vm1 = vcmp.eq.s32.totalorder %v2921_v33, %v2832_v51 }
 0x18d   : > { %v3260_v42 = vadd.f32 %v1919_v14, %v490_v45  ;;  %762 = vperm.xlu1 %2443, %v2452_v23   ;;  %v2262_v9 = vpack.c.bf16 %v1391_v19, %v1390_v2 }
 0x18f   : > { %v966_v59 = vpop.permute.xlu1 %965  ;;  %2263 = vmatprep.subr.bf16.mxu1 %v2262_v9 }
 0x190   : > { %2265 = vmatpush3.bf16.msra.mxu1 %v2262_v9  ;;  %vm998_vm4 = vcmp.eq.s32.totalorder %v966_v59, %v2832_v51 }
 0x191   : > { %765 = vperm.xlu1 %2443, %v2734_v21   ;;  %v1979_v34 = vsel %vm998_vm4, 1.0, %v2527_v54  ;;  %vm557_vm4 = vcmp.eq.s32.totalorder %v3631_v43, %v2832_v51 }
 0x192   : > { %v1046_v50 = vadd.f32 %v1979_v34, %v3164_v28  ;;  %v1159_v28 = vadd.f32 %v1996_v60, %v3091_v40  ;;  %v1922_v46 = vsel %vm557_vm4, 1.0, %v2527_v54 }
 0x194   : > { %v421_v36 = vpop.permute.xlu1 %420  ;;  %v1158_v45 = vadd.f32 %v1995_v8, %v1046_v50  ;;  %v1175_v5 = vmul.f32 0.125, %v1159_v28 }
 0x195   : > { %vm443_vm3 = vcmp.eq.s32.totalorder %v421_v36, %v2832_v51  ;;  %2445 = vset.pattern.permute.xlu1 %v3630_v35  ;;  %v3632_v36 = vld [vmem:[#allocation6_spill] sm:$0xff] }
 0x196   : > { %v1904_v13 = vsel %vm443_vm3, 1.0, %v2527_v54  ;;  %983 = vperm.xlu1 %2445, %v2453_v6   ;;  %v1174_v37 = vmul.f32 0.125, %v1158_v45  ;;  %vm445_vm3 = vcmp.eq.s32.totalorder %v2869_v4, %v2832_v51 }
 0x197   : > { %v491_v21 = vadd.f32 %v1904_v13, %v1888_v7  ;;  %v1906_v33 = vsel %vm445_vm3, 1.0, %v2527_v54 }
 0x199   : > { %v639_v29 = vpop.permute.xlu1 %638 }
 0x19a   : > { %vm665_vm8 = vcmp.eq.s32.totalorder %v639_v29, %v2832_v51  ;;  %2447 = vset.pattern.permute.xlu1 %v3629_v57 }
 0x19b   : > { %v1934_v39 = vsel %vm665_vm8, 1.0, %v2527_v54  ;;  %1092 = vperm.xlu1 %2447, %v2451_v11  }
 0x19c   : > { %v3290_v53 = vadd.f32 %v1934_v39, %v601_v41  ;;  %v1937_v41 = vsel %vm668_vm1, 1.0, %v2527_v54 }
 0x19e   : > { %v1075_v61 = vpop.permute.xlu1 %1074 }
 0x19f   : > { %vm1109_vm10 = vcmp.eq.s32.totalorder %v1075_v61, %v2832_v51  ;;  %2448 = vset.pattern.permute.xlu1 %v3625_v22  ;;  %v1905_v22 = vsel %vm444_vm11, 1.0, %v2527_v54  ;;  %v1087_v61 = vpop.permute.xlu0 %1086 }
 0x1a0   : > { %v1994_v24 = vsel %vm1109_vm10, 1.0, %v2527_v54  ;;  %877 = vperm.xlu1 %2448, %v2454_v25   ;;  %vm558_vm10 = vcmp.eq.s32.totalorder %v3632_v36, %v2832_v51  ;;  %vm1113_vm3 = vcmp.eq.s32.totalorder %v1087_v61, %v2832_v51 }
 0x1a1   : > { %v1157_v47 = vadd.f32 %v1994_v24, %v1045_v26  ;;  %v1923_v34 = vsel %vm558_vm10, 1.0, %v2527_v54 }
 0x1a3   : > { %v1173_v63 = vmul.f32 0.125, %v1157_v47  ;;  %v312_v10 = vpop.permute.xlu1 %311 }
 0x1a4   : > { %vm332_vm12 = vcmp.eq.s32.totalorder %v312_v10, %v2832_v51  ;;  %2449 = vset.pattern.permute.xlu1 %v3630_v35 }
 0x1a5   : > { %v1889_v20 = vsel %vm332_vm12, 1.0, %v2527_v54  ;;  %986 = vperm.xlu1 %2449, %v2452_v23   ;;  %2143 = vmatprep.mubr.msk.f32.mxu0 %vm1190_vm14, %v1173_v63  ;;  %vm1002_vm12 = vcmp.eq.s32.totalorder %v3633_v48, %v2832_v51 }
 0x1a6   : > { %v492_v40 = vadd.f32 %v1905_v22, %v1889_v20  ;;  %2144 = vmatmul.mubr.msk.f32.gmra.mrb[6].mxu0 %vm1190_vm14, %v1174_v37  ;;  %v1983_v60 = vsel %vm1002_vm12, 1.0, %v2527_v54 }
 0x1a7   : > { %2146 = vmatprep.mubr.msk.f32.mxu0 %vm1190_vm14, %v1175_v5 }
 0x1a8   : > { %v642_v3 = vpop.permute.xlu1 %641 }
 0x1a9   : > { %989 = vperm.xlu1 %2449, %v2454_v25   ;;  %vm666_vm7 = vcmp.eq.s32.totalorder %v642_v3, %v2832_v51 }
 0x1aa   : > { %v1935_v7 = vsel %vm666_vm7, 1.0, %v2527_v54 }
 0x1ab   : > { %v714_v29 = vadd.f32 %v1935_v7, %v3260_v42 }
 0x1ad   : > { %2450 = vset.pattern.permute.xlu1 %v3629_v57  ;;  %v860_v35 = vpop.permute.xlu1 %859 }
 0x1ae   : > { %vm888_vm15 = vcmp.eq.s32.totalorder %v860_v35, %v2832_v51  ;;  %1101 = vperm.xlu1 %2450, %v2454_v25   ;;  %v1090_v25 = vpop.permute.xlu0 %1089 }
 0x1af   : > { %v1965_v0 = vsel %vm888_vm15, 1.0, %v2527_v54 }
 0x1b0   : > { %v936_v31 = vadd.f32 %v1965_v0, %v3237_v44 }
 0x1b2   : > { %v533_v38 = vpop.permute.xlu1 %532  ;;  %v1048_v62 = vadd.f32 %v1981_v55, %v936_v31  ;;  %v1096_v7 = vpop.permute.xlu0 %1095 }
 0x1b3   : > { %vm555_vm0 = vcmp.eq.s32.totalorder %v533_v38, %v2832_v51 }
 0x1b4   : > { %v1920_v11 = vsel %vm555_vm0, 1.0, %v2527_v54 }
 0x1b5   : > { %v603_v56 = vadd.f32 %v1920_v11, %v491_v21 }
 0x1b7   : > { %v751_v1 = vpop.permute.xlu1 %750 }
 0x1b8   : > { %vm777_vm0 = vcmp.eq.s32.totalorder %v751_v1, %v2832_v51 }
 0x1b9   : > { %v1950_v63 = vsel %vm777_vm0, 1.0, %v2527_v54  ;;  %vm1116_vm0 = vcmp.eq.s32.totalorder %v1096_v7, %v2832_v51 }
 0x1ba   : > { %v825_v37 = vadd.f32 %v1950_v63, %v3290_v53 }
 0x1bc   : > { %v536_v30 = vpop.permute.xlu1 %535 }
 0x1bd   : > { %vm556_vm2 = vcmp.eq.s32.totalorder %v536_v30, %v2832_v51 }
 0x1be   : > { %v1921_v57 = vsel %vm556_vm2, 1.0, %v2527_v54  ;;  %vm1114_vm2 = vcmp.eq.s32.totalorder %v1090_v25, %v2832_v51 }
 0x1bf   : > { %v604_v17 = vadd.f32 %v1921_v57, %v492_v40  ;;  %v1999_v20 = vsel %vm1114_vm2, 1.0, %v2527_v54  ;;  %v1998_v40 = vsel %vm1113_vm3, 1.0, %v2527_v54 }
 0x1c1   : > { %v754_v44 = vpop.permute.xlu1 %753  ;;  %v3323_v12 = vadd.f32 %v1937_v41, %v604_v17 }
 0x1c2   : > { %vm778_vm9 = vcmp.eq.s32.totalorder %v754_v44, %v2832_v51 }
 0x1c3   : > { %v1951_v21 = vsel %vm778_vm9, 1.0, %v2527_v54  ;;  %vm893_vm9 = vcmp.eq.s32.totalorder %v3079_v49, %v2832_v51 }
 0x1c4   : > { %v826_v50 = vadd.f32 %v1951_v21, %v714_v29 }
 0x1c6   : > { %v315_v14 = vpop.permute.xlu1 %314 }
 0x1c7   : > { %vm333_vm5 = vcmp.eq.s32.totalorder %v315_v14, %v2832_v51 }
 0x1c8   : > { %v1890_v18 = vsel %vm333_vm5, 1.0, %v2527_v54 }
 0x1c9   : > { %v493_v23 = vadd.f32 %v1906_v33, %v1890_v18 }
 0x1cb   : > { %v645_v15 = vpop.permute.xlu1 %644  ;;  %v3333_v59 = vadd.f32 %v1922_v46, %v493_v23  ;;  %v1970_v23 = vsel %vm893_vm9, 1.0, %v2527_v54 }
 0x1cc   : > { %vm667_vm6 = vcmp.eq.s32.totalorder %v645_v15, %v2832_v51 }
 0x1cd   : > { %v1936_v4 = vsel %vm667_vm6, 1.0, %v2527_v54  ;;  %vm1003_vm6 = vcmp.eq.s32.totalorder %v2989_v16, %v2832_v51 }
 0x1ce   : > { %v715_v2 = vadd.f32 %v1936_v4, %v603_v56  ;;  %v1984_v17 = vsel %vm1003_vm6, 1.0, %v2527_v54 }
 0x1d0   : > { %v863_v19 = vpop.permute.xlu1 %862 }
 0x1d1   : > { %vm889_vm1 = vcmp.eq.s32.totalorder %v863_v19, %v2832_v51 }
 0x1d2   : > { %v1966_v10 = vsel %vm889_vm1, 1.0, %v2527_v54 }
 0x1d3   : > { %v937_v5 = vadd.f32 %v1966_v10, %v825_v37 }
 0x1d5   : > { %v318_v9 = vpop.permute.xlu1 %317 }
 0x1d6   : > { %vm334_vm8 = vcmp.eq.s32.totalorder %v318_v9, %v2832_v51 }
 0x1d7   : > { %v1891_v13 = vsel %vm334_vm8, 1.0, %v2527_v54 }
 0x1da   : > { %v430_v32 = vpop.permute.xlu1 %429 }
 0x1db   : > { %vm446_vm11 = vcmp.eq.s32.totalorder %v430_v32, %v2832_v51 }
 0x1dc   : > { %v1907_v6 = vsel %vm446_vm11, 1.0, %v2527_v54 }
 0x1dd   : > { %v494_v52 = vadd.f32 %v1907_v6, %v1891_v13 }
 0x1df   : > { %v866_v27 = vpop.permute.xlu1 %865  ;;  %v3349_v39 = vadd.f32 %v1923_v34, %v494_v52  ;;  %v2001_v52 = vsel %vm1116_vm0, 1.0, %v2527_v54 }
 0x1e0   : > { %vm890_vm13 = vcmp.eq.s32.totalorder %v866_v27, %v2832_v51 }
 0x1e1   : > { %v1967_v8 = vsel %vm890_vm13, 1.0, %v2527_v54  ;;  %vm1399_vm13 = vcmask 261120  }
 0x1e2   : > { %v938_v58 = vadd.f32 %v1967_v8, %v826_v50  ;;  %v1099_v8 = vpop.permute.xlu0 %1098 }
 0x1e4   : > { %v1050_v26 = vadd.f32 %v1983_v60, %v938_v58  ;;  %v1084_v45 = vpop.permute.xlu1 %1083 }
 0x1e5   : > { %vm1112_vm15 = vcmp.eq.s32.totalorder %v1084_v45, %v2832_v51 }
 0x1e6   : > { %v1997_v42 = vsel %vm1112_vm15, 1.0, %v2527_v54  ;;  %v1162_v55 = vadd.f32 %v1999_v20, %v1050_v26 }
 0x1e7   : > { %v1160_v24 = vadd.f32 %v1997_v42, %v1048_v62 }
 0x1e8   : > { %v1178_v62 = vmul.f32 0.125, %v1162_v55 }
 0x1e9   : > { %v1176_v28 = vmul.f32 0.125, %v1160_v24  ;;  %v757_v47 = vpop.permute.xlu1 %756 }
 0x1ea   : > { %vm779_vm5 = vcmp.eq.s32.totalorder %v757_v47, %v2832_v51 }
 0x1eb   : > { %2147 = vmatmul.mubr.msk.f32.gmra.mrb[8].mxu0 %vm1190_vm14, %v1176_v28  ;;  %v1952_v11 = vsel %vm779_vm5, 1.0, %v2527_v54 }
 0x1ec   : > { %v827_v1 = vadd.f32 %v1952_v11, %v715_v2  ;;  %v1614_v11 = vld [vmem:[%s3600_s4 + $0x28] sm:$0xff] }
 0x1ee   : > { %v975_v22 = vpop.permute.xlu1 %974 }
 0x1ef   : > { %vm1001_vm4 = vcmp.eq.s32.totalorder %v975_v22, %v2832_v51 }
 0x1f0   : > { %v1982_v3 = vsel %vm1001_vm4, 1.0, %v2527_v54  ;;  %vm1117_vm4 = vcmp.eq.s32.totalorder %v1099_v8, %v2832_v51 }
 0x1f1   : > { %v1049_v35 = vadd.f32 %v1982_v3, %v937_v5  ;;  %v2002_v28 = vsel %vm1117_vm4, 1.0, %v2527_v54 }
 0x1f3   : > { %v1161_v0 = vadd.f32 %v1998_v40, %v1049_v35  ;;  %v760_v31 = vpop.permute.xlu1 %759 }
 0x1f4   : > { %vm780_vm11 = vcmp.eq.s32.totalorder %v760_v31, %v2832_v51  ;;  %v1610_v31 = vld [vmem:[%s3600_s4 + $0x8] sm:$0xff] }
 0x1f5   : > { %v1177_v38 = vmul.f32 0.125, %v1161_v0  ;;  %v1953_v4 = vsel %vm780_vm11, 1.0, %v2527_v54  ;;  %v1609_v0 = vld [vmem:[%s3600_s4] sm:$0xff] }
 0x1f6   : > { %v828_v49 = vadd.f32 %v1953_v4, %v3323_v12  ;;  %v1623_v4 = vld [vmem:[%s3600_s4 + $0x70] sm:$0xff] }
 0x1f7   : > { %2149 = vmatprep.mubr.msk.f32.mxu0 %vm1190_vm14, %v1177_v38  ;;  %v1611_v38 = vld [vmem:[%s3600_s4 + $0x10] sm:$0xff] }
 0x1f8   : > { %2150 = vmatmul.mubr.msk.f32.gmra.mrb[10].mxu0 %vm1190_vm14, %v1178_v62  ;;  %v651_v53 = vpop.permute.xlu1 %650  ;;  %v2266_v62 = vpack.c.bf16 %v1610_v31, %v1609_v0 }
 0x1f9   : > { %vm669_vm8 = vcmp.eq.s32.totalorder %v651_v53, %v2832_v51  ;;  %v1613_v53 = vld [vmem:[%s3600_s4 + $0x20] sm:$0xff] }
 0x1fa   : > { %v1938_v14 = vsel %vm669_vm8, 1.0, %v2527_v54  ;;  %2267 = vmatprep.subr.bf16.mxu0 %v2266_v62  ;;  %2298 = vmatprep.subr.bf16.mxu1 %v2266_v62 }
 0x1fb   : > { %v717_v16 = vadd.f32 %v1938_v14, %v3333_v59  ;;  %2269 = vmatpush3.bf16.msra.mxu0 %v2266_v62 }
 0x1fd   : > { %v869_v56 = vpop.permute.xlu1 %868 }
 0x1fe   : > { %vm891_vm7 = vcmp.eq.s32.totalorder %v869_v56, %v2832_v51  ;;  %v2274_v56 = vpack.c.bf16 %v1614_v11, %v1613_v53 }
 0x1ff   : > { %v1968_v30 = vsel %vm891_vm7, 1.0, %v2527_v54 }
 0x200   : > { %v939_v57 = vadd.f32 %v1968_v30, %v827_v1  ;;  %v1615_v1 = vld [vmem:[%s3600_s4 + $0x30] sm:$0xff]  ;;  %v1616_v30 = vld [vmem:[%s3600_s4 + $0x38] sm:$0xff] }
 0x202   : > { %v654_v41 = vpop.permute.xlu1 %653  ;;  %v1051_v44 = vadd.f32 %v1984_v17, %v939_v57 }
 0x203   : > { %vm670_vm2 = vcmp.eq.s32.totalorder %v654_v41, %v2832_v51  ;;  %v2278_v41 = vpack.c.bf16 %v1616_v30, %v1615_v1  ;;  %v3504_v1 = vld [vmem:[%s3601_s5] ss:$0 sm:$0xff] }
 0x204   : > { %v1939_v26 = vsel %vm670_vm2, 1.0, %v2527_v54 }
 0x205   : > { %v718_v25 = vadd.f32 %v1939_v26, %v3349_v39 }
 0x207   : > { %v872_v43 = vpop.permute.xlu1 %871 }
 0x208   : > { %vm892_vm12 = vcmp.eq.s32.totalorder %v872_v43, %v2832_v51  ;;  %v1618_v43 = vld [vmem:[%s3600_s4 + $0x48] sm:$0xff] }
 0x209   : > { %v1969_v19 = vsel %vm892_vm12, 1.0, %v2527_v54 }
 0x20a   : > { %v940_v36 = vadd.f32 %v1969_v19, %v828_v49 }
 0x20c   : > { %v763_v33 = vpop.permute.xlu1 %762 }
 0x20d   : > { %vm781_vm10 = vcmp.eq.s32.totalorder %v763_v33, %v2832_v51  ;;  %v1619_v33 = vld [vmem:[%s3600_s4 + $0x50] sm:$0xff] }
 0x20e   : > { %v1954_v46 = vsel %vm781_vm10, 1.0, %v2527_v54 }
 0x20f   : > { %v829_v18 = vadd.f32 %v1954_v46, %v717_v16  ;;  %v1620_v16 = vld [vmem:[%s3600_s4 + $0x58] sm:$0xff] }
 0x210   : > { %v766_v15 = vpop.permute.xlu1 %765  ;;  %v2286_v46 = vpack.c.bf16 %v1620_v16, %v1619_v33 }
 0x211   : > { %v941_v2 = vadd.f32 %v1970_v23, %v829_v18  ;;  %vm782_vm3 = vcmp.eq.s32.totalorder %v766_v15, %v2832_v51  ;;  %v1621_v18 = vld [vmem:[%s3600_s4 + $0x60] sm:$0xff]  ;;  %v1622_v23 = vld [vmem:[%s3600_s4 + $0x68] sm:$0xff] }
 0x212   : > { %v1955_v42 = vsel %vm782_vm3, 1.0, %v2527_v54  ;;  %v2290_v15 = vpack.c.bf16 %v1622_v23, %v1621_v18 }
 0x213   : > { %v830_v37 = vadd.f32 %v1955_v42, %v718_v25 }
 0x214   : > { %v2136_v59 = vpop.f32.mrb[0].mxu0 }
 0x215   : > { %v1309_v9 = vpop.f32.mrb[1].mxu0  ;;  %v984_v32 = vpop.permute.xlu1 %983 }
 0x216   : > { %vm1004_vm15 = vcmp.eq.s32.totalorder %v984_v32, %v2832_v51  ;;  %2166 = vmatprep.mubr.msk.f32.mxu1 %vm1399_vm13, %v1309_v9 }
 0x217   : > { %v1985_v13 = vsel %vm1004_vm15, 1.0, %v2527_v54  ;;  %2167 = vmatmul.mubr.msk.f32.vlgmr.msra.gmra.mrb[0].mxu1 %vm1399_vm13, %v2136_v59 }
 0x218   : > { %v1052_v6 = vadd.f32 %v1985_v13, %v940_v36  ;;  %2306 = vmatpush3.bf16.msra.mxu1 %v2266_v62  ;;  %v3480_v13 = vld [vmem:[%s3599_s3] ss:$0 sm:$0xff] }
 0x21a   : > { %v1093_v21 = vpop.permute.xlu1 %1092  ;;  %v1164_v12 = vadd.f32 %v2001_v52, %v1052_v6 }
 0x21b   : > { %vm1115_vm1 = vcmp.eq.s32.totalorder %v1093_v21, %v2832_v51 }
 0x21c   : > { %v2000_v34 = vsel %vm1115_vm1, 1.0, %v2527_v54  ;;  %v1180_v50 = vmul.f32 0.125, %v1164_v12 }
 0x21d   : > { %v1163_v29 = vadd.f32 %v2000_v34, %v1051_v44  ;;  %v1617_v44 = vld [vmem:[%s3600_s4 + $0x40] sm:$0xff] }
 0x21e   : > { %v2282_v14 = vpack.c.bf16 %v1618_v43, %v1617_v44 }
 0x21f   : > { %v1179_v27 = vmul.f32 0.125, %v1163_v29  ;;  %v878_v48 = vpop.permute.xlu1 %877 }
 0x220   : > { %vm894_vm6 = vcmp.eq.s32.totalorder %v878_v48, %v2832_v51 }
 0x221   : > { %2152 = vmatprep.mubr.msk.f32.mxu0 %vm1190_vm14, %v1179_v27  ;;  %v1971_v63 = vsel %vm894_vm6, 1.0, %v2527_v54 }
 0x222   : > { %2153 = vmatmul.mubr.msk.f32.gmra.mrb[12].mxu0 %vm1190_vm14, %v1180_v50  ;;  %v942_v20 = vadd.f32 %v1971_v63, %v830_v37 }
 0x223   : > { %v2139_v58 = vpop.f32.mrb[2].mxu0 }
 0x224   : > { %v1319_v60 = vpop.f32.mrb[3].mxu0  ;;  %v987_v61 = vpop.permute.xlu1 %986 }
 0x225   : > { %vm1005_vm5 = vcmp.eq.s32.totalorder %v987_v61, %v2832_v51  ;;  %2169 = vmatprep.mubr.msk.f32.mxu1 %vm1399_vm13, %v1319_v60 }
 0x226   : > { %v1986_v45 = vsel %vm1005_vm5, 1.0, %v2527_v54  ;;  %2170 = vmatmul.mubr.msk.f32.gmra.mrb[2].mxu1 %vm1399_vm13, %v2139_v58 }
 0x227   : > { %v1053_v24 = vadd.f32 %v1986_v45, %v941_v2  ;;  %v1624_v2 = vld [vmem:[%s3600_s4 + $0x78] sm:$0xff] }
 0x228   : > { %v990_v47 = vpop.permute.xlu1 %989  ;;  %v2294_v19 = vpack.c.bf16 %v1624_v2, %v1623_v4 }
 0x229   : > { %v1165_v10 = vadd.f32 %v2002_v28, %v1053_v24  ;;  %vm1006_vm7 = vcmp.eq.s32.totalorder %v990_v47, %v2832_v51 }
 0x22a   : > { %v1987_v5 = vsel %vm1006_vm7, 1.0, %v2527_v54 }
 0x22b   : > { %v1181_v22 = vmul.f32 0.125, %v1165_v10  ;;  %v1054_v3 = vadd.f32 %v1987_v5, %v942_v20 }
 0x22d   : > { %2155 = vmatprep.mubr.msk.f32.mxu0 %vm1190_vm14, %v1181_v22  ;;  %v1102_v40 = vpop.permute.xlu1 %1101 }
 0x22e   : > { %vm1118_vm8 = vcmp.eq.s32.totalorder %v1102_v40, %v2832_v51  ;;  %v1612_v51 = vld [vmem:[%s3600_s4 + $0x18] sm:$0xff] }
 0x22f   : > { %v2003_v39 = vsel %vm1118_vm8, 1.0, %v2527_v54  ;;  %v2270_v54 = vpack.c.bf16 %v1612_v51, %v1611_v38 }
 0x230   : > { %v1166_v35 = vadd.f32 %v2003_v39, %v1054_v3 }
 0x231   : > { %2271 = vmatprep.subr.bf16.mxu0 %v2270_v54  ;;  %2299 = vmatprep.subr.bf16.mxu1 %v2270_v54 }
 0x232   : > { %v1182_v55 = vmul.f32 0.125, %v1166_v35  ;;  %2273 = vmatpush3.bf16.msra.mxu0 %v2270_v54  ;;  %2307 = vmatpush3.bf16.msra.mxu1 %v2270_v54 }
 0x233   : > { %2275 = vmatprep.subr.bf16.mxu0 %v2274_v56  ;;  %2300 = vmatprep.subr.bf16.mxu1 %v2274_v56 }
 0x234   : > { %2156 = vmatmul.mubr.msk.f32.gmra.mrb[14].mxu0 %vm1190_vm14, %v1182_v55 }
 0x236   : > { %2277 = vmatpush3.bf16.msra.mxu0 %v2274_v56  ;;  %2308 = vmatpush3.bf16.msra.mxu1 %v2274_v56 }
 0x237   : > { %2279 = vmatprep.subr.bf16.mxu0 %v2278_v41  ;;  %2301 = vmatprep.subr.bf16.mxu1 %v2278_v41 }
 0x23a   : > { %2281 = vmatpush3.bf16.msra.mxu0 %v2278_v41  ;;  %2309 = vmatpush3.bf16.msra.mxu1 %v2278_v41 }
 0x23b   : > { %2283 = vmatprep.subr.bf16.mxu0 %v2282_v14  ;;  %2302 = vmatprep.subr.bf16.mxu1 %v2282_v14 }
 0x23e   : > { %2285 = vmatpush3.bf16.msra.mxu0 %v2282_v14  ;;  %2310 = vmatpush3.bf16.msra.mxu1 %v2282_v14 }
 0x23f   : > { %2287 = vmatprep.subr.bf16.mxu0 %v2286_v46  ;;  %2303 = vmatprep.subr.bf16.mxu1 %v2286_v46 }
 0x242   : > { %2289 = vmatpush3.bf16.msra.mxu0 %v2286_v46  ;;  %2311 = vmatpush3.bf16.msra.mxu1 %v2286_v46 }
 0x243   : > { %2291 = vmatprep.subr.bf16.mxu0 %v2290_v15  ;;  %2304 = vmatprep.subr.bf16.mxu1 %v2290_v15 }
 0x246   : > { %2293 = vmatpush3.bf16.msra.mxu0 %v2290_v15  ;;  %2312 = vmatpush3.bf16.msra.mxu1 %v2290_v15 }
 0x247   : > { %2295 = vmatprep.subr.bf16.mxu0 %v2294_v19  ;;  %2305 = vmatprep.subr.bf16.mxu1 %v2294_v19 }
 0x24a   : > { %2297 = vmatpush3.bf16.msra.mxu0 %v2294_v19  ;;  %2313 = vmatpush3.bf16.msra.mxu1 %v2294_v19 }
 0x255   : > { %v2142_v57 = vpop.f32.mrb[4].mxu0 }
 0x256   : > { %v1329_v17 = vpop.f32.mrb[5].mxu0 }
 0x257   : > { %2172 = vmatprep.mubr.msk.f32.mxu1 %vm1399_vm13, %v1329_v17 }
 0x258   : > { %2173 = vmatmul.mubr.msk.f32.gmra.mrb[4].mxu1 %vm1399_vm13, %v2142_v57 }
 0x279   : > { %v2145_v49 = vpop.f32.mrb[6].mxu0 }
 0x27a   : > { %v1339_v59 = vpop.f32.mrb[7].mxu0 }
 0x27b   : > { %2175 = vmatprep.mubr.msk.f32.mxu1 %vm1399_vm13, %v1339_v59 }
 0x27c   : > { %2176 = vmatmul.mubr.msk.f32.gmra.mrb[6].mxu1 %vm1399_vm13, %v2145_v49 }
 0x2be   : > { %v2148_v9 = vpop.f32.mrb[8].mxu0 }
 0x2bf   : > { %v1349_v32 = vpop.f32.mrb[9].mxu0 }
 0x2c0   : > { %2178 = vmatprep.mubr.msk.f32.mxu1 %vm1399_vm13, %v1349_v32 }
 0x2c1   : > { %2179 = vmatmul.mubr.msk.f32.gmra.mrb[8].mxu1 %vm1399_vm13, %v2148_v9 }
 0x2cb   : > { %v2151_v36 = vpop.f32.mrb[10].mxu0 }
 0x2cc   : > { %v1359_v7 = vpop.f32.mrb[11].mxu0 }
 0x2cd   : > { %2181 = vmatprep.mubr.msk.f32.mxu1 %vm1399_vm13, %v1359_v7 }
 0x2ce   : > { %2182 = vmatmul.mubr.msk.f32.gmra.mrb[10].mxu1 %vm1399_vm13, %v2151_v36 }
 0x2ea   : > { %v2168_v6 = vpop.f32.mrb[0].mxu1 }
 0x2eb   : > { %v1520_v21 = vadd.f32 %v2168_v6, %v3480_v13  ;;  %v1514_v52 = vpop.f32.mrb[1].mxu1 }
 0x2ec   : > { %v1515_v12 = vadd.f32 %v3480_v13, %v1514_v52 }
 0x2ed   : > { %v1594_v29 = vmax.f32 %v1520_v21, 0.0 }
 0x2ee   : > { %v1593_v34 = vmax.f32 %v1515_v12, 0.0 }
 0x2f0   : > { %2222 = vmatprep.mubr.f32.mxu0 %v1593_v34 }
 0x2f1   : > { %2223 = vmatmul.mubr.f32.vlgmr.msra.gmra.mrb[16].mxu0 %v1594_v29 }
 0x2f5   : > { %v2154_v27 = vpop.f32.mrb[12].mxu0 }
 0x2f6   : > { %v1369_v48 = vpop.f32.mrb[13].mxu0 }
 0x2f7   : > { %2184 = vmatprep.mubr.msk.f32.mxu1 %vm1399_vm13, %v1369_v48 }
 0x2f8   : > { %2185 = vmatmul.mubr.msk.f32.gmra.mrb[12].mxu1 %vm1399_vm13, %v2154_v27 }
 0x2f9   : > { %v2171_v50 = vpop.f32.mrb[2].mxu1 }
 0x2fa   : > { %v1530_v8 = vadd.f32 %v2171_v50, %v3480_v13  ;;  %v1524_v58 = vpop.f32.mrb[3].mxu1 }
 0x2fb   : > { %v1525_v60 = vadd.f32 %v3480_v13, %v1524_v58 }
 0x2fc   : > { %v1596_v26 = vmax.f32 %v1530_v8, 0.0 }
 0x2fd   : > { %v1595_v61 = vmax.f32 %v1525_v60, 0.0 }
 0x2ff   : > { %2225 = vmatprep.mubr.f32.mxu0 %v1595_v61 }
 0x300   : > { %2226 = vmatmul.mubr.f32.gmra.mrb[18].mxu0 %v1596_v26 }
 0x307   : > { %v2157_v45 = vpop.f32.mrb[14].mxu0 }
 0x308   : > { %v1379_v42 = vpop.f32.mrb[15].mxu0 }
 0x309   : > { %2187 = vmatprep.mubr.msk.f32.mxu1 %vm1399_vm13, %v1379_v42 }
 0x30a   : > { %2188 = vmatmul.mubr.msk.f32.gmra.mrb[14].mxu1 %vm1399_vm13, %v2157_v45 }
 0x32b   : > { %v2174_v24 = vpop.f32.mrb[4].mxu1 }
 0x32c   : > { %v1540_v25 = vadd.f32 %v2174_v24, %v3480_v13  ;;  %v1534_v28 = vpop.f32.mrb[5].mxu1 }
 0x32d   : > { %v1535_v47 = vadd.f32 %v3480_v13, %v1534_v28 }
 0x32e   : > { %v1598_v10 = vmax.f32 %v1540_v25, 0.0 }
 0x32f   : > { %v1597_v63 = vmax.f32 %v1535_v47, 0.0 }
 0x331   : > { %2228 = vmatprep.mubr.f32.mxu0 %v1597_v63 }
 0x332   : > { %2229 = vmatmul.mubr.f32.gmra.mrb[20].mxu0 %v1598_v10 }
 0x34f   : > { %v2177_v37 = vpop.f32.mrb[6].mxu1 }
 0x350   : > { %v1550_v22 = vadd.f32 %v2177_v37, %v3480_v13  ;;  %v1544_v5 = vpop.f32.mrb[7].mxu1 }
 0x351   : > { %v1545_v20 = vadd.f32 %v3480_v13, %v1544_v5 }
 0x352   : > { %v1600_v3 = vmax.f32 %v1550_v22, 0.0 }
 0x353   : > { %v1599_v40 = vmax.f32 %v1545_v20, 0.0 }
 0x355   : > { %2231 = vmatprep.mubr.f32.mxu1 %v1599_v40 }
 0x356   : > { %2232 = vmatmul.mubr.f32.vlgmr.msra.gmra.mrb[16].mxu1 %v1600_v3 }
 0x394   : > { %v2180_v39 = vpop.f32.mrb[8].mxu1 }
 0x395   : > { %v1560_v35 = vadd.f32 %v2180_v39, %v3480_v13  ;;  %v1554_v55 = vpop.f32.mrb[9].mxu1 }
 0x396   : > { %v1555_v0 = vadd.f32 %v3480_v13, %v1554_v55 }
 0x397   : > { %v1602_v38 = vmax.f32 %v1560_v35, 0.0 }
 0x398   : > { %v1601_v31 = vmax.f32 %v1555_v0, 0.0 }
 0x39a   : > { %2234 = vmatprep.mubr.f32.mxu1 %v1601_v31 }
 0x39b   : > { %2235 = vmatmul.mubr.f32.gmra.mrb[18].mxu1 %v1602_v38 }
 0x3a1   : > { %v2183_v62 = vpop.f32.mrb[10].mxu1 }
 0x3a2   : > { %v1570_v51 = vadd.f32 %v2183_v62, %v3480_v13  ;;  %v1564_v54 = vpop.f32.mrb[11].mxu1 }
 0x3a3   : > { %v1565_v53 = vadd.f32 %v3480_v13, %v1564_v54 }
 0x3a4   : > { %v1604_v56 = vmax.f32 %v1570_v51, 0.0 }
 0x3a5   : > { %v1603_v11 = vmax.f32 %v1565_v53, 0.0 }
 0x3a7   : > { %2237 = vmatprep.mubr.f32.mxu1 %v1603_v11 }
 0x3a8   : > { %2238 = vmatmul.mubr.f32.gmra.mrb[20].mxu1 %v1604_v56 }
 0x3c4   : > { %v2224_v30 = vpop.f32.mrb[16].mxu0 }
 0x3c5   : > { %v1704_v57 = vadd.f32 %v2224_v30, %v3504_v1  ;;  %v1698_v17 = vpop.f32.mrb[17].mxu0 }
 0x3c6   : > { %v1699_v41 = vadd.f32 %v3504_v1, %v1698_v17 }
 0x3c7   : > { %1778 = vst [vmem:[%s3508_s15 + $0x8] sm:$0xff] %v1704_v57 }
 0x3c8   : > { %1777 = vst [vmem:[%s3508_s15] sm:$0xff] %v1699_v41 }
 0x3cb   : > { %v2186_v44 = vpop.f32.mrb[12].mxu1 }
 0x3cc   : > { %v1580_v43 = vadd.f32 %v2186_v44, %v3480_v13  ;;  %v1574_v14 = vpop.f32.mrb[13].mxu1 }
 0x3cd   : > { %v1575_v33 = vadd.f32 %v3480_v13, %v1574_v14 }
 0x3ce   : > { %v1606_v46 = vmax.f32 %v1580_v43, 0.0 }
 0x3cf   : > { %v1605_v16 = vmax.f32 %v1575_v33, 0.0 }
 0x3d1   : > { %2240 = vmatprep.mubr.f32.mxu1 %v1605_v16 }
 0x3d2   : > { %2241 = vmatmul.mubr.f32.gmra.mrb[22].mxu1 %v1606_v46 }
 0x3d3   : > { %v2227_v18 = vpop.f32.mrb[18].mxu0 }
 0x3d4   : > { %v1714_v23 = vadd.f32 %v2227_v18, %v3504_v1  ;;  %v1708_v15 = vpop.f32.mrb[19].mxu0 }
 0x3d5   : > { %v1709_v4 = vadd.f32 %v3504_v1, %v1708_v15 }
 0x3d6   : > { %1780 = vst [vmem:[%s3508_s15 + $0x18] sm:$0xff] %v1714_v23 }
 0x3d7   : > { %1779 = vst [vmem:[%s3508_s15 + $0x10] sm:$0xff] %v1709_v4 }
 0x3dd   : > { %v2189_v2 = vpop.f32.mrb[14].mxu1 }
 0x3de   : > { %v1590_v19 = vadd.f32 %v2189_v2, %v3480_v13  ;;  %v1584_v49 = vpop.f32.mrb[15].mxu1 }
 0x3df   : > { %v1585_v59 = vadd.f32 %v3480_v13, %v1584_v49 }
 0x3e0   : > { %v1608_v32 = vmax.f32 %v1590_v19, 0.0 }
 0x3e1   : > { %v1607_v9 = vmax.f32 %v1585_v59, 0.0 }
 0x3e3   : > { %2243 = vmatprep.mubr.f32.mxu1 %v1607_v9 }
 0x3e4   : > { %2244 = vmatmul.mubr.f32.gmra.mrb[24].mxu1 %v1608_v32 }
 0x405   : > { %v2230_v36 = vpop.f32.mrb[20].mxu0 }
 0x406   : > { %v1724_v7 = vadd.f32 %v2230_v36, %v3504_v1  ;;  %v1718_v6 = vpop.f32.mrb[21].mxu0 }
 0x407   : > { %v1719_v21 = vadd.f32 %v3504_v1, %v1718_v6 }
 0x408   : > { %1782 = vst [vmem:[%s3508_s15 + $0x28] sm:$0xff] %v1724_v7 }
 0x409   : > { %1781 = vst [vmem:[%s3508_s15 + $0x20] sm:$0xff] %v1719_v21 }
 0x429   : > { %v2233_v52 = vpop.f32.mrb[16].mxu1 }
 0x42a   : > { %v1734_v12 = vadd.f32 %v2233_v52, %v3504_v1  ;;  %v1728_v13 = vpop.f32.mrb[17].mxu1 }
 0x42b   : > { %v1729_v34 = vadd.f32 %v3504_v1, %v1728_v13 }
 0x42c   : > { %1784 = vst [vmem:[%s3508_s15 + $0x38] sm:$0xff] %v1734_v12 }
 0x42d   : > { %1783 = vst [vmem:[%s3508_s15 + $0x30] sm:$0xff] %v1729_v34 }
 0x46e   : > { %v2236_v29 = vpop.f32.mrb[18].mxu1 }
 0x46f   : > { %v1744_v27 = vadd.f32 %v2236_v29, %v3504_v1  ;;  %v1738_v48 = vpop.f32.mrb[19].mxu1 }
 0x470   : > { %v1739_v50 = vadd.f32 %v3504_v1, %v1738_v48 }
 0x471   : > { %1786 = vst [vmem:[%s3508_s15 + $0x48] sm:$0xff] %v1744_v27 }
 0x472   : > { %1785 = vst [vmem:[%s3508_s15 + $0x40] sm:$0xff] %v1739_v50 }
 0x47b   : > { %v2239_v8 = vpop.f32.mrb[20].mxu1 }
 0x47c   : > { %v1754_v58 = vadd.f32 %v2239_v8, %v3504_v1  ;;  %v1748_v60 = vpop.f32.mrb[21].mxu1 }
 0x47d   : > { %v1749_v61 = vadd.f32 %v3504_v1, %v1748_v60 }
 0x47e   : > { %1788 = vst [vmem:[%s3508_s15 + $0x58] sm:$0xff] %v1754_v58 }
 0x47f   : > { %1787 = vst [vmem:[%s3508_s15 + $0x50] sm:$0xff] %v1749_v61 }
 0x4a5   : > { %v2242_v26 = vpop.f32.mrb[22].mxu1 }
 0x4a6   : > { %v1764_v45 = vadd.f32 %v2242_v26, %v3504_v1  ;;  %v1758_v42 = vpop.f32.mrb[23].mxu1 }
 0x4a7   : > { %v1759_v24 = vadd.f32 %v3504_v1, %v1758_v42 }
 0x4a8   : > { %1790 = vst [vmem:[%s3508_s15 + $0x68] sm:$0xff] %v1764_v45 }
 0x4a9   : > { %1789 = vst [vmem:[%s3508_s15 + $0x60] sm:$0xff] %v1759_v24 }
 0x4b7   : > { %v2245_v25 = vpop.f32.mrb[24].mxu1 }
 0x4b8   : > { %v1774_v28 = vadd.f32 %v2245_v25, %v3504_v1  ;;  %v1768_v47 = vpop.f32.mrb[25].mxu1 }
 0x4b9   : > { %v1769_v63 = vadd.f32 %v3504_v1, %v1768_v47 }
 0x4ba   : > { %1792 = vst [vmem:[%s3508_s15 + $0x78] sm:$0xff] %v1774_v28 }
 0x4bb   : > { %1791 = vst [vmem:[%s3508_s15 + $0x70] sm:$0xff] %v1769_v63 }
 0x4bc   : > { %2468 = shalt.err (!%p2465_p3)
}
 0x4bd   : > { %s2469_s9 = scalar_lea.hbm %s3546_s20, 2048  ;;  %s2473_s12 = scalar_lea.hbm %s3602_s6, 4096 }
 0x4be   : > { %p2470_p4 = scmp.ne.s32.totalorder %s3546_s20, %s2469_s9  ;;  %p2474_p9 = scmp.lt.u32.totalorder %s3546_s20, %s3602_s6 }
 0x4bf   : > { %p2475_p10 = scmp.lt.u32.totalorder %s2473_s12, %s2469_s9  ;;  %p2477_p12 = scmp.lt.u32.totalorder %s2469_s9, %s3546_s20 }
 0x4c0   : > { %p2471_p7 = pnand %p2470_p4, %p2604_p5 }
 0x4c1   : > { %p2476_p11 = por %p2475_p10, %p2474_p9 }
 0x4c2   : > { %p2472_p8 = pneg %p2471_p7 }
 0x4c3   : > { %p2478_p13 = por %p2477_p12, %p2476_p11 }
 0x4c5   : > { %p2479_p0 = pnand %p2478_p13, %p2472_p8 }
 0x4c7   : > { %2482 = shalt.err (!%p2479_p0)
}
 0x4c8   : > { %s2529_s16 = smov 128   ;;  %s2530_s18 = smov 8  }
 0x4c9   : > { %2314 = dma.vmem_to_hbm [thread:$0]  (%p2604_p5), %s3548_s17, 2048, %s3546_s20, %s3555_s25, %s2529_s16, %s2529_s16, %s2530_s18  }
 0x4ca PF: > { %p2320_p1 = scmp.ge.s32.totalorder %s2517_s24, 2  ;;  %s1822_s19 = sand.u32 1, %s2505_s21  }
 0x4cb   : > { %s1823_s26 = scalar_lea.sflag [#allocation3], %s1822_s19 }
 0x4cc   : > { %p2317_p2 = pnand %p2320_p1, %p2608_p6 }
 0x4ce   : > { %2500 = dma.done.wait (!%p2317_p2), %s1823_s26, 2048  }
 0x4cf   : > { %2502 = vsyncadd (!%p2317_p2), %s1823_s26, 4294965248  ;;  %p16_p3 = scmp.ge.s32.totalorder %s2591_s27, 4   ;;  %s3634_s21 = smov %s2509_s22 }
 0x4d0   : > { %s3635_s22 = smov %s2513_s23  ;;  %s3636_s23 = smov %s2602_s30 }
 0x4d1   : > { %s3637_s24 = smov %s2591_s27  ;;  %18 = sbr.rel (!%p16_p3) target bundleno = 3 (0x3), region = 79 }
 0x4d8   :  { %1828 = vsyncpa [#allocation3], 1 }
 0x4d9   :  { %1830 = vsyncpa [#allocation3 + $0x1], 1 }

</bundles_post_ra>
